<compile_context>
chip_gen: v7x
topology: tpu7x:2x2x1
jax: 0.10.0
libtpu: 0.0.40
codegen_flags: <defaults>
</compile_context>

<pallas_src>
import functools

import jax
import jax.numpy as jnp
from jax.experimental import pallas as pl
from jax.experimental.pallas import tpu as pltpu

_EPS = 1e-5  # nn.BatchNorm1d default eps


# --------------------------------------------------------------------------
# Fused kernel: encode both views + Barlow Twins loss, one pallas_call.
# --------------------------------------------------------------------------
def _barlow_twins_fused_kernel(
    x1_ref, x2_ref,                           # (N, in_dim) each, one per view
    w_bb_ref, b_bb_ref,                       # backbone linear
    w0_ref, b0_ref, g0_ref, bt0_ref,          # projector layer 0 (Linear+BN+ReLU)
    w1_ref, b1_ref, g1_ref, bt1_ref,          # projector layer 1 (Linear+BN+ReLU)
    w2_ref,                                   # projector layer 2 (Linear, bias=False)
    o_ref,                                    # (1, 1) SMEM scalar loss
    *, n, batch_size, lambd,
):
    def bn_per_view(h):
        # BatchNorm training-mode forward, computed PER VIEW (the torch module
        # runs the projector separately on y1 and y2).  The (2n, D) -> (2, n, D)
        # reshape is layout-preserving because n is a multiple of 8 (one f32
        # sublane tile), so this is a single batched reduce, no copies.
        d = h.shape[-1]
        hv = h.reshape(2, n, d)
        mu = jnp.mean(hv, axis=1, keepdims=True)
        var = jnp.mean((hv - mu) ** 2, axis=1, keepdims=True)
        hn = (hv - mu) * jax.lax.rsqrt(var + _EPS)
        return hn.reshape(2 * n, d)

    def linear_bn_relu(hin, w_ref, b_ref, g_ref, beta_ref):
        h = (
            jnp.dot(hin, w_ref[...], preferred_element_type=jnp.float32)
            + b_ref[...]
        )
        return jnp.maximum(bn_per_view(h) * g_ref[...] + beta_ref[...], 0.0)

    # Join the two views inside VMEM (rows [0:n] = view 1, [n:2n] = view 2).
    x = jnp.concatenate([x1_ref[...], x2_ref[...]], axis=0)   # (2N, in_dim)

    # "backbone": single linear projection to rep_dim.
    # TODO(synk): full timm ResNet backbone replaced by one linear layer.
    h = (
        jnp.dot(x, w_bb_ref[...], preferred_element_type=jnp.float32)
        + b_bb_ref[...]
    )

    # projector
    h = linear_bn_relu(h, w0_ref, b0_ref, g0_ref, bt0_ref)
    h = linear_bn_relu(h, w1_ref, b1_ref, g1_ref, bt1_ref)
    z = jnp.dot(h, w2_ref[...], preferred_element_type=jnp.float32)  # bias=False

    # loss: c = bn(z1).T @ bn(z2) / batch_size (contract batch axis, no .T)
    zn = bn_per_view(z)
    c = jax.lax.dot_general(
        zn[:n], zn[n:],
        dimension_numbers=(((0,), (0,)), ((), ())),
        preferred_element_type=jnp.float32,
    ) / jnp.float32(batch_size)
    # TODO(synk): torch.distributed.all_reduce(c) omitted (single device).
    # TODO(synk): c is divided by `batch_size`, not n; they coincide here but
    # differ if run with a global batch != per-device n.

    # Single masked reduction: on_diag + lambd * off_diag.
    d = c.shape[0]
    row = jax.lax.broadcasted_iota(jnp.int32, (d, d), 0)
    col = jax.lax.broadcasted_iota(jnp.int32, (d, d), 1)
    loss_terms = jnp.where(row == col, (c - 1.0) ** 2, jnp.float32(lambd) * c * c)
    o_ref[0, 0] = jnp.sum(loss_terms)


# --------------------------------------------------------------------------
# Wrapper: one jit'd function, one pallas_call for the whole forward pass.
# --------------------------------------------------------------------------
@functools.partial(jax.jit, static_argnames=("batch_size", "lambd"))
def barlow_twins_forward(y1, y2, params, batch_size, lambd):
    n = y1.shape[0]
    assert n % 8 == 0, "per-view BN reshape assumes n is a multiple of 8 (f32 sublane)"

    x1 = y1.reshape(n, -1).astype(jnp.float32)   # bitcast-reshape of contiguous NCHW
    x2 = y2.reshape(n, -1).astype(jnp.float32)
    in_dim = x1.shape[1]

    rep = params["w_bb"].shape[1]
    d0 = params["w0"].shape[1]
    d1 = params["w1"].shape[1]
    d2 = params["w2"].shape[1]

    # Advisory cost estimate so XLA schedules the surrounding (tiny) ops
    # around this latency-bound custom call.
    flops = 2 * (2 * n) * (in_dim * rep + rep * d0 + d0 * d1 + d1 * d2) \
        + 2 * n * d2 * d2
    bytes_accessed = (
        2 * n * in_dim * 4
        + sum(int(v.size) for v in params.values()) * 4
        + 4
    )
    cost = pl.CostEstimate(flops=flops, transcendentals=0,
                           bytes_accessed=bytes_accessed)

    kern = functools.partial(
        _barlow_twins_fused_kernel, n=n, batch_size=batch_size, lambd=lambd
    )
    vmem = pl.BlockSpec(memory_space=pltpu.MemorySpace.VMEM)

    out = pl.pallas_call(
        kern,
        out_shape=jax.ShapeDtypeStruct((1, 1), jnp.float32),
        in_specs=[vmem] * 13,
        out_specs=pl.BlockSpec(memory_space=pltpu.MemorySpace.SMEM),
        cost_estimate=cost,
    )(
        x1, x2,
        params["w_bb"], params["b_bb"],
        params["w0"], params["b0"], params["g0"], params["bt0"],
        params["w1"], params["b1"], params["g1"], params["bt1"],
        params["w2"],
    )
    return out[0, 0]


# --------------------------------------------------------------------------
# Pure-JAX reference (mirrors the PyTorch forward) for a sanity check.
# --------------------------------------------------------------------------
def _reference_forward(y1, y2, params, batch_size, lambd):
    n = y1.shape[0]

    def bn_norm(h):
        mu = jnp.mean(h, axis=0, keepdims=True)
        var = jnp.mean((h - mu) ** 2, axis=0, keepdims=True)
        return (h - mu) * jax.lax.rsqrt(var + _EPS)

    def encode(x):
        h = x @ params["w_bb"] + params["b_bb"]
        h = jnp.maximum(bn_norm(h @ params["w0"] + params["b0"]) * params["g0"]
                        + params["bt0"], 0.0)
        h = jnp.maximum(bn_norm(h @ params["w1"] + params["b1"]) * params["g1"]
                        + params["bt1"], 0.0)
        return h @ params["w2"]

    z1 = encode(y1.reshape(n, -1).astype(jnp.float32))
    z2 = encode(y2.reshape(n, -1).astype(jnp.float32))
    c = bn_norm(z1).T @ bn_norm(z2) / batch_size
    eye = jnp.eye(c.shape[0], dtype=jnp.float32)
    on_diag = jnp.sum(eye * (c - 1.0) ** 2)
    off_diag = jnp.sum((1.0 - eye) * c ** 2)
    return on_diag + lambd * off_diag


# --------------------------------------------------------------------------
# Parameter construction (deterministic, synthetic)
# --------------------------------------------------------------------------
def make_params(key, in_dim, rep_dim, mlp_dims):
    keys = jax.random.split(key, 4)
    d0, d1, d2 = mlp_dims

    def init_w(k, shape):
        fan_in = shape[0]
        return (jax.random.normal(k, shape, jnp.float32)
                / jnp.sqrt(fan_in)).astype(jnp.float32)

    return {
        "w_bb": init_w(keys[0], (in_dim, rep_dim)),
        "b_bb": jnp.zeros((1, rep_dim), jnp.float32),
        "w0": init_w(keys[1], (rep_dim, d0)),
        "b0": jnp.zeros((1, d0), jnp.float32),
        "g0": jnp.ones((1, d0), jnp.float32),
        "bt0": jnp.zeros((1, d0), jnp.float32),
        "w1": init_w(keys[2], (d0, d1)),
        "b1": jnp.zeros((1, d1), jnp.float32),
        "g1": jnp.ones((1, d1), jnp.float32),
        "bt1": jnp.zeros((1, d1), jnp.float32),
        "w2": init_w(keys[3], (d1, d2)),
    }


if __name__ == "__main__":
    # args analog: arch="resnet*", mlp="128-128-128", batch_size=8, lambd=0.005
    mlp_dims = (128, 128, 128)   # lane-dense projector widths; embedding_dim = 128
    rep_dim = 128                # backbone output features (lane-dense)
    batch_size = 8
    lambd = 0.005

    key = jax.random.PRNGKey(0)
    k_y1, k_y2, k_p = jax.random.split(key, 3)

    # NCHW images, small shapes
    y1 = jax.random.normal(k_y1, (batch_size, 3, 16, 16), jnp.float32)
    y2 = jax.random.normal(k_y2, (batch_size, 3, 16, 16), jnp.float32)

    in_dim = 3 * 16 * 16
    params = make_params(k_p, in_dim, rep_dim, mlp_dims)

    loss = barlow_twins_forward(y1, y2, params, batch_size, lambd)
    loss = jax.block_until_ready(loss)
    assert loss.shape == () and jnp.isfinite(loss)

    ref = jax.block_until_ready(
        _reference_forward(y1, y2, params, batch_size, lambd)
    )
    assert jnp.allclose(loss, ref, rtol=5e-2, atol=5e-2), (loss, ref)

    print("KERNEL_OK")
</pallas_src>

<mosaic_0001>
module attributes {stable_mosaic.version = 11 : i64} {
  func.func @_barlow_twins_fused_kernel(%arg0: memref<8x768xf32, #tpu.memory_space<vmem>>, %arg1: memref<8x768xf32, #tpu.memory_space<vmem>>, %arg2: memref<768x128xf32, #tpu.memory_space<vmem>>, %arg3: memref<1x128xf32, #tpu.memory_space<vmem>>, %arg4: memref<128x128xf32, #tpu.memory_space<vmem>>, %arg5: memref<1x128xf32, #tpu.memory_space<vmem>>, %arg6: memref<1x128xf32, #tpu.memory_space<vmem>>, %arg7: memref<1x128xf32, #tpu.memory_space<vmem>>, %arg8: memref<128x128xf32, #tpu.memory_space<vmem>>, %arg9: memref<1x128xf32, #tpu.memory_space<vmem>>, %arg10: memref<1x128xf32, #tpu.memory_space<vmem>>, %arg11: memref<1x128xf32, #tpu.memory_space<vmem>>, %arg12: memref<128x128xf32, #tpu.memory_space<vmem>>, %arg13: memref<1x1xf32, #tpu.memory_space<smem>>) attributes {dimension_semantics = [], scalar_prefetch = 0 : i64, scratch_operands = 0 : i64, tpu.core_type = #tpu.core_type<tc>} {
    %c0 = arith.constant 0 : index
    %c0_0 = arith.constant 0 : index
    %0 = vector.load %arg0[%c0, %c0_0] : memref<8x768xf32, #tpu.memory_space<vmem>>, vector<8x768xf32>
    %c0_1 = arith.constant 0 : index
    %c0_2 = arith.constant 0 : index
    %1 = vector.load %arg1[%c0_1, %c0_2] : memref<8x768xf32, #tpu.memory_space<vmem>>, vector<8x768xf32>
    %2 = tpu.concatenate %0, %1 in 0 : vector<8x768xf32>, vector<8x768xf32> -> vector<16x768xf32>
    %c0_3 = arith.constant 0 : index
    %c0_4 = arith.constant 0 : index
    %3 = vector.load %arg2[%c0_3, %c0_4] : memref<768x128xf32, #tpu.memory_space<vmem>>, vector<768x128xf32>
    %cst = arith.constant dense<0.000000e+00> : vector<16x128xf32>
    %4 = tpu.matmul %2, %3, %cst {dimension_numbers = #tpu.dot_dimension_numbers<[1], [0], [0], [1], [0, 0, 1, 1], [], []>} : vector<16x768xf32>, vector<768x128xf32>, vector<16x128xf32> -> vector<16x128xf32>
    %c0_5 = arith.constant 0 : index
    %c0_6 = arith.constant 0 : index
    %5 = vector.load %arg3[%c0_5, %c0_6] : memref<1x128xf32, #tpu.memory_space<vmem>>, vector<1x128xf32>
    %6 = vector.broadcast %5 : vector<1x128xf32> to vector<16x128xf32>
    %7 = arith.addf %4, %6 : vector<16x128xf32>
    %c0_7 = arith.constant 0 : index
    %c0_8 = arith.constant 0 : index
    %8 = vector.load %arg4[%c0_7, %c0_8] : memref<128x128xf32, #tpu.memory_space<vmem>>, vector<128x128xf32>
    %cst_9 = arith.constant dense<0.000000e+00> : vector<16x128xf32>
    %9 = tpu.matmul %7, %8, %cst_9 {dimension_numbers = #tpu.dot_dimension_numbers<[1], [0], [0], [1], [0, 0, 1, 1], [], []>} : vector<16x128xf32>, vector<128x128xf32>, vector<16x128xf32> -> vector<16x128xf32>
    %c0_10 = arith.constant 0 : index
    %c0_11 = arith.constant 0 : index
    %10 = vector.load %arg5[%c0_10, %c0_11] : memref<1x128xf32, #tpu.memory_space<vmem>>, vector<1x128xf32>
    %11 = vector.broadcast %10 : vector<1x128xf32> to vector<16x128xf32>
    %12 = arith.addf %9, %11 : vector<16x128xf32>
    %13 = vector.shape_cast %12 : vector<16x128xf32> to vector<2x8x128xf32>
    %cst_12 = arith.constant dense<0.000000e+00> : vector<2x128xf32>
    %14 = vector.multi_reduction <add>, %13, %cst_12 [1] : vector<2x8x128xf32> to vector<2x128xf32>
    %15 = vector.shape_cast %14 : vector<2x128xf32> to vector<2x1x128xf32>
    %cst_13 = arith.constant 8.000000e+00 : f32
    %16 = vector.broadcast %cst_13 : f32 to vector<2x1x128xf32>
    %17 = arith.divf %15, %16 : vector<2x1x128xf32>
    %18 = vector.broadcast %17 : vector<2x1x128xf32> to vector<2x8x128xf32>
    %19 = arith.subf %13, %18 : vector<2x8x128xf32>
    %20 = arith.mulf %19, %19 : vector<2x8x128xf32>
    %cst_14 = arith.constant dense<0.000000e+00> : vector<2x128xf32>
    %21 = vector.multi_reduction <add>, %20, %cst_14 [1] : vector<2x8x128xf32> to vector<2x128xf32>
    %22 = vector.shape_cast %21 : vector<2x128xf32> to vector<2x1x128xf32>
    %cst_15 = arith.constant 8.000000e+00 : f32
    %23 = vector.broadcast %cst_15 : f32 to vector<2x1x128xf32>
    %24 = arith.divf %22, %23 : vector<2x1x128xf32>
    %25 = vector.broadcast %17 : vector<2x1x128xf32> to vector<2x8x128xf32>
    %26 = arith.subf %13, %25 : vector<2x8x128xf32>
    %cst_16 = arith.constant 9.99999974E-6 : f32
    %27 = vector.broadcast %cst_16 : f32 to vector<2x1x128xf32>
    %28 = arith.addf %24, %27 : vector<2x1x128xf32>
    %29 = math.rsqrt %28 : vector<2x1x128xf32>
    %30 = vector.broadcast %29 : vector<2x1x128xf32> to vector<2x8x128xf32>
    %31 = arith.mulf %26, %30 : vector<2x8x128xf32>
    %32 = vector.shape_cast %31 : vector<2x8x128xf32> to vector<16x128xf32>
    %c0_17 = arith.constant 0 : index
    %c0_18 = arith.constant 0 : index
    %33 = vector.load %arg6[%c0_17, %c0_18] : memref<1x128xf32, #tpu.memory_space<vmem>>, vector<1x128xf32>
    %34 = vector.broadcast %33 : vector<1x128xf32> to vector<16x128xf32>
    %35 = arith.mulf %32, %34 : vector<16x128xf32>
    %c0_19 = arith.constant 0 : index
    %c0_20 = arith.constant 0 : index
    %36 = vector.load %arg7[%c0_19, %c0_20] : memref<1x128xf32, #tpu.memory_space<vmem>>, vector<1x128xf32>
    %37 = vector.broadcast %36 : vector<1x128xf32> to vector<16x128xf32>
    %38 = arith.addf %35, %37 : vector<16x128xf32>
    %cst_21 = arith.constant 0.000000e+00 : f32
    %39 = vector.broadcast %cst_21 : f32 to vector<16x128xf32>
    %40 = arith.maximumf %38, %39 : vector<16x128xf32>
    %c0_22 = arith.constant 0 : index
    %c0_23 = arith.constant 0 : index
    %41 = vector.load %arg8[%c0_22, %c0_23] : memref<128x128xf32, #tpu.memory_space<vmem>>, vector<128x128xf32>
    %cst_24 = arith.constant dense<0.000000e+00> : vector<16x128xf32>
    %42 = tpu.matmul %40, %41, %cst_24 {dimension_numbers = #tpu.dot_dimension_numbers<[1], [0], [0], [1], [0, 0, 1, 1], [], []>} : vector<16x128xf32>, vector<128x128xf32>, vector<16x128xf32> -> vector<16x128xf32>
    %c0_25 = arith.constant 0 : index
    %c0_26 = arith.constant 0 : index
    %43 = vector.load %arg9[%c0_25, %c0_26] : memref<1x128xf32, #tpu.memory_space<vmem>>, vector<1x128xf32>
    %44 = vector.broadcast %43 : vector<1x128xf32> to vector<16x128xf32>
    %45 = arith.addf %42, %44 : vector<16x128xf32>
    %46 = vector.shape_cast %45 : vector<16x128xf32> to vector<2x8x128xf32>
    %cst_27 = arith.constant dense<0.000000e+00> : vector<2x128xf32>
    %47 = vector.multi_reduction <add>, %46, %cst_27 [1] : vector<2x8x128xf32> to vector<2x128xf32>
    %48 = vector.shape_cast %47 : vector<2x128xf32> to vector<2x1x128xf32>
    %cst_28 = arith.constant 8.000000e+00 : f32
    %49 = vector.broadcast %cst_28 : f32 to vector<2x1x128xf32>
    %50 = arith.divf %48, %49 : vector<2x1x128xf32>
    %51 = vector.broadcast %50 : vector<2x1x128xf32> to vector<2x8x128xf32>
    %52 = arith.subf %46, %51 : vector<2x8x128xf32>
    %53 = arith.mulf %52, %52 : vector<2x8x128xf32>
    %cst_29 = arith.constant dense<0.000000e+00> : vector<2x128xf32>
    %54 = vector.multi_reduction <add>, %53, %cst_29 [1] : vector<2x8x128xf32> to vector<2x128xf32>
    %55 = vector.shape_cast %54 : vector<2x128xf32> to vector<2x1x128xf32>
    %cst_30 = arith.constant 8.000000e+00 : f32
    %56 = vector.broadcast %cst_30 : f32 to vector<2x1x128xf32>
    %57 = arith.divf %55, %56 : vector<2x1x128xf32>
    %58 = vector.broadcast %50 : vector<2x1x128xf32> to vector<2x8x128xf32>
    %59 = arith.subf %46, %58 : vector<2x8x128xf32>
    %cst_31 = arith.constant 9.99999974E-6 : f32
    %60 = vector.broadcast %cst_31 : f32 to vector<2x1x128xf32>
    %61 = arith.addf %57, %60 : vector<2x1x128xf32>
    %62 = math.rsqrt %61 : vector<2x1x128xf32>
    %63 = vector.broadcast %62 : vector<2x1x128xf32> to vector<2x8x128xf32>
    %64 = arith.mulf %59, %63 : vector<2x8x128xf32>
    %65 = vector.shape_cast %64 : vector<2x8x128xf32> to vector<16x128xf32>
    %c0_32 = arith.constant 0 : index
    %c0_33 = arith.constant 0 : index
    %66 = vector.load %arg10[%c0_32, %c0_33] : memref<1x128xf32, #tpu.memory_space<vmem>>, vector<1x128xf32>
    %67 = vector.broadcast %66 : vector<1x128xf32> to vector<16x128xf32>
    %68 = arith.mulf %65, %67 : vector<16x128xf32>
    %c0_34 = arith.constant 0 : index
    %c0_35 = arith.constant 0 : index
    %69 = vector.load %arg11[%c0_34, %c0_35] : memref<1x128xf32, #tpu.memory_space<vmem>>, vector<1x128xf32>
    %70 = vector.broadcast %69 : vector<1x128xf32> to vector<16x128xf32>
    %71 = arith.addf %68, %70 : vector<16x128xf32>
    %cst_36 = arith.constant 0.000000e+00 : f32
    %72 = vector.broadcast %cst_36 : f32 to vector<16x128xf32>
    %73 = arith.maximumf %71, %72 : vector<16x128xf32>
    %c0_37 = arith.constant 0 : index
    %c0_38 = arith.constant 0 : index
    %74 = vector.load %arg12[%c0_37, %c0_38] : memref<128x128xf32, #tpu.memory_space<vmem>>, vector<128x128xf32>
    %cst_39 = arith.constant dense<0.000000e+00> : vector<16x128xf32>
    %75 = tpu.matmul %73, %74, %cst_39 {dimension_numbers = #tpu.dot_dimension_numbers<[1], [0], [0], [1], [0, 0, 1, 1], [], []>} : vector<16x128xf32>, vector<128x128xf32>, vector<16x128xf32> -> vector<16x128xf32>
    %76 = vector.shape_cast %75 : vector<16x128xf32> to vector<2x8x128xf32>
    %cst_40 = arith.constant dense<0.000000e+00> : vector<2x128xf32>
    %77 = vector.multi_reduction <add>, %76, %cst_40 [1] : vector<2x8x128xf32> to vector<2x128xf32>
    %78 = vector.shape_cast %77 : vector<2x128xf32> to vector<2x1x128xf32>
    %cst_41 = arith.constant 8.000000e+00 : f32
    %79 = vector.broadcast %cst_41 : f32 to vector<2x1x128xf32>
    %80 = arith.divf %78, %79 : vector<2x1x128xf32>
    %81 = vector.broadcast %80 : vector<2x1x128xf32> to vector<2x8x128xf32>
    %82 = arith.subf %76, %81 : vector<2x8x128xf32>
    %83 = arith.mulf %82, %82 : vector<2x8x128xf32>
    %cst_42 = arith.constant dense<0.000000e+00> : vector<2x128xf32>
    %84 = vector.multi_reduction <add>, %83, %cst_42 [1] : vector<2x8x128xf32> to vector<2x128xf32>
    %85 = vector.shape_cast %84 : vector<2x128xf32> to vector<2x1x128xf32>
    %cst_43 = arith.constant 8.000000e+00 : f32
    %86 = vector.broadcast %cst_43 : f32 to vector<2x1x128xf32>
    %87 = arith.divf %85, %86 : vector<2x1x128xf32>
    %88 = vector.broadcast %80 : vector<2x1x128xf32> to vector<2x8x128xf32>
    %89 = arith.subf %76, %88 : vector<2x8x128xf32>
    %cst_44 = arith.constant 9.99999974E-6 : f32
    %90 = vector.broadcast %cst_44 : f32 to vector<2x1x128xf32>
    %91 = arith.addf %87, %90 : vector<2x1x128xf32>
    %92 = math.rsqrt %91 : vector<2x1x128xf32>
    %93 = vector.broadcast %92 : vector<2x1x128xf32> to vector<2x8x128xf32>
    %94 = arith.mulf %89, %93 : vector<2x8x128xf32>
    %95 = vector.shape_cast %94 : vector<2x8x128xf32> to vector<16x128xf32>
    %96 = vector.extract_strided_slice %95 {offsets = [0, 0], sizes = [8, 128], strides = [1, 1]} : vector<16x128xf32> to vector<8x128xf32>
    %97 = vector.extract_strided_slice %95 {offsets = [8, 0], sizes = [8, 128], strides = [1, 1]} : vector<16x128xf32> to vector<8x128xf32>
    %cst_45 = arith.constant dense<0.000000e+00> : vector<128x128xf32>
    %98 = tpu.matmul %96, %97, %cst_45 {dimension_numbers = #tpu.dot_dimension_numbers<[0], [0], [1], [1], [0, 1, 1, 1], [], []>} : vector<8x128xf32>, vector<8x128xf32>, vector<128x128xf32> -> vector<128x128xf32>
    %cst_46 = arith.constant 8.000000e+00 : f32
    %99 = vector.broadcast %cst_46 : f32 to vector<128x128xf32>
    %100 = arith.divf %98, %99 : vector<128x128xf32>
    %101 = tpu.iota {dimensions = array<i32: 0>} : vector<128x128xi32>
    %102 = tpu.iota {dimensions = array<i32: 1>} : vector<128x128xi32>
    %103 = arith.cmpi eq, %101, %102 : vector<128x128xi32>
    %cst_47 = arith.constant 1.000000e+00 : f32
    %104 = vector.broadcast %cst_47 : f32 to vector<128x128xf32>
    %105 = arith.subf %100, %104 : vector<128x128xf32>
    %106 = arith.mulf %105, %105 : vector<128x128xf32>
    %cst_48 = arith.constant 5.000000e-03 : f32
    %107 = vector.broadcast %cst_48 : f32 to vector<128x128xf32>
    %108 = arith.mulf %107, %100 : vector<128x128xf32>
    %109 = arith.mulf %108, %100 : vector<128x128xf32>
    %110 = arith.select %103, %106, %109 : vector<128x128xi1>, vector<128x128xf32>
    %111 = vector.shape_cast %110 : vector<128x128xf32> to vector<1x128x128xf32>
    %cst_49 = arith.constant dense<0.000000e+00> : vector<1xf32>
    %112 = vector.multi_reduction <add>, %111, %cst_49 [1, 2] : vector<1x128x128xf32> to vector<1xf32>
    %113 = vector.shape_cast %112 : vector<1xf32> to vector<1x1x1xf32>
    %114 = vector.extract %113[0, 0, 0] : f32 from vector<1x1x1xf32>
    %c0_50 = arith.constant 0 : index
    %c0_51 = arith.constant 0 : index
    %115 = memref.load %arg13[%c0_50, %c0_51] : memref<1x1xf32, #tpu.memory_space<smem>>
    memref.store %114, %arg13[%c0_50, %c0_51] : memref<1x1xf32, #tpu.memory_space<smem>>
    return
  }
}

</mosaic_0001>

<bundles_post_ra>
// kernel: barlow_twins_forward.1
= control target key start
LH: loop header
LB: loop body
LE: loop exit
PB: predicated region body
PF: predicated region fallthrough
CT: control target
= control target key end

     0   :  { %18 = vsyncpa [#allocation3], 0  ;;  %s2438_s0 = inlined_call_operand.vmem [shape: f32[8,768], index: 0, kind: input, shape index: {}]   ;;  %s2439_s1 = inlined_call_operand.vmem [shape: f32[8,768], index: 1, kind: input, shape index: {}]   ;;  %s2440_s2 = inlined_call_operand.vmem [shape: f32[768,128], index: 2, kind: input, shape index: {}]   ;;  %s2441_s3 = inlined_call_operand.vmem [shape: f32[1,128], index: 3, kind: input, shape index: {}]   ;;  %s2442_s4 = inlined_call_operand.vmem [shape: f32[128,128], index: 4, kind: input, shape index: {}]   ;;  %s2443_s5 = inlined_call_operand.vmem [shape: f32[1,128], index: 5, kind: input, shape index: {}]   ;;  %s2444_s6 = inlined_call_operand.vmem [shape: f32[1,128], index: 6, kind: input, shape index: {}]   ;;  %s2445_s7 = inlined_call_operand.vmem [shape: f32[1,128], index: 7, kind: input, shape index: {}]   ;;  %s2446_s8 = inlined_call_operand.hbm [shape: f32[128,128], index: 8, kind: input, shape index: {}]   ;;  %s2447_s9 = inlined_call_operand.vmem [shape: f32[1,128], index: 9, kind: input, shape index: {}]   ;;  %s2448_s10 = inlined_call_operand.vmem [shape: f32[1,128], index: 10, kind: input, shape index: {}]   ;;  %s2449_s11 = inlined_call_operand.vmem [shape: f32[1,128], index: 11, kind: input, shape index: {}]   ;;  %s2450_s12 = inlined_call_operand.hbm [shape: f32[128,128], index: 12, kind: input, shape index: {}]   ;;  %s2451_s13 = inlined_call_operand.hbm [shape: f32[1,1], index: 13, kind: output, shape index: {}]  }
   0x1   :  { %19 = vsyncpa [#allocation6], 0 }
   0x2   :  { %20 = vsyncpa [#allocation4], 0  ;;  %s1882_s25 = smov [#allocation2]   ;;  %s1822_s29 = scalar_lea.hbm %s2446_s8, 2048 }
   0x3   :  { %s42_s26 = sshll.u32 %s1882_s25, 4  ;;  %p1823_p0 = scmp.ne.s32.totalorder %s2446_s8, %s1822_s29  ;;  %s43_s26 = int_to_ptr.vmem [resolvable:$true] %s42_s26 }
   0x4   :  { %p1826_p1 = scmp.lt.u32.totalorder %s1822_s29, %s2446_s8 }
   0x6   :  { %p1828_p2 = pnand %p1826_p1, %p1823_p0 }
   0x8   :  { %1831 = shalt.err (!%p1828_p2)
}
   0x9   :  { %s1832_s17 = scalar_lea.vmem %s43_s26, 2048  ;;  %p1837_p4 = scmp.lt.s32.totalorder %s43_s26, %s43_s26 }
   0xa   :  { %p1833_p3 = scmp.ne.s32.totalorder %s43_s26, %s1832_s17  ;;  %p1838_p5 = scmp.lt.s32.totalorder %s1832_s17, %s1832_s17 }
   0xc   :  { %p1839_p6 = por %p1838_p5, %p1837_p4 }
   0xe   :  { %p1840_p7 = pnand %p1839_p6, %p1833_p3 }
  0x10   :  { %1843 = shalt.err (!%p1840_p7)
}
  0x11   :  { %s1883_s18 = smov 128   ;;  %s1884_s19 = smov 8  }
  0x12   :  { %48 = dma.hbm_to_vmem [thread:$0]  %s2446_s8, 2048, %s43_s26, [#allocation3], %s1883_s18, %s1883_s18, %s1884_s19  }
  0x13   :  { %s1885_s22 = smov [#allocation5]   ;;  %s1844_s27 = scalar_lea.hbm %s2450_s12, 2048 }
  0x14   :  { %s60_s23 = sshll.u32 %s1885_s22, 4  ;;  %p1845_p8 = scmp.ne.s32.totalorder %s2450_s12, %s1844_s27  ;;  %s61_s23 = int_to_ptr.vmem [resolvable:$true] %s60_s23 }
  0x15   :  { %p1848_p9 = scmp.lt.u32.totalorder %s1844_s27, %s2450_s12 }
  0x17   :  { %p1850_p10 = pnand %p1848_p9, %p1845_p8 }
  0x19   :  { %1853 = shalt.err (!%p1850_p10)
}
  0x1a   :  { %s1854_s15 = scalar_lea.vmem %s61_s23, 2048  ;;  %p1859_p12 = scmp.lt.s32.totalorder %s61_s23, %s61_s23 }
  0x1b   :  { %p1855_p11 = scmp.ne.s32.totalorder %s61_s23, %s1854_s15  ;;  %p1860_p13 = scmp.lt.s32.totalorder %s1854_s15, %s1854_s15 }
  0x1d   :  { %p1861_p0 = por %p1860_p13, %p1859_p12 }
  0x1f   :  { %p1862_p1 = pnand %p1861_p0, %p1855_p11 }
  0x21   :  { %1865 = shalt.err (!%p1862_p1)
}
  0x22   :  { %66 = dma.hbm_to_vmem [thread:$0]  %s2450_s12, 2048, %s61_s23, [#allocation6], %s1883_s18, %s1883_s18, %s1884_s19  }
  0x23   :  { %1876 = dma.done.wait [#allocation3], 2048  }
  0x24   :  { %1877 = vsyncadd [#allocation3], 4294965248 }
  0x25   :  { %1878 = dma.done.wait [#allocation6], 2048  }
  0x26   :  { %1879 = vsyncadd [#allocation6], 4294965248  ;;  %v101_v0 = vld [vmem:[%s2440_s2 + $0x80] sm:$0xff]  ;;  %v102_v1 = vld [vmem:[%s2440_s2 + $0x88] sm:$0xff]  ;;  %vm887_vm0 = vcmask 64512   ;;  %s1866_s22 = scalar_lea.hbm %s2451_s13, 16 }
  0x27   :  { %v85_v2 = vld [vmem:[%s2440_s2] sm:$0xff]  ;;  %v1608_v3 = vpack.c.bf16 %v102_v1, %v101_v0  ;;  %v86_v4 = vld [vmem:[%s2440_s2 + $0x8] sm:$0xff]  ;;  %v103_v11 = vld [vmem:[%s2440_s2 + $0x90] sm:$0xff]  ;;  %p1867_p2 = scmp.ne.s32.totalorder %s2451_s13, %s1866_s22  ;;  %p1870_p3 = scmp.lt.u32.totalorder %s1866_s22, %s2451_s13 }
  0x28   :  { %v133_v5 = vld [vmem:[%s2440_s2 + $0x180] sm:$0xff]  ;;  %v134_v6 = vld [vmem:[%s2440_s2 + $0x188] sm:$0xff]  ;;  %v1610_v7 = vpack.c.bf16 %v86_v4, %v85_v2  ;;  %v104_v13 = vld [vmem:[%s2440_s2 + $0x98] sm:$0xff] }
  0x29   :  { %v1640_v8 = vpack.c.bf16 %v134_v6, %v133_v5  ;;  %v117_v9 = vld [vmem:[%s2440_s2 + $0x100] sm:$0xff]  ;;  %v118_v10 = vld [vmem:[%s2440_s2 + $0x108] sm:$0xff]  ;;  %1609 = vmatprep.subr.bf16.mxu0 %v1608_v3  ;;  %v87_v14 = vld [vmem:[%s2440_s2 + $0x10] sm:$0xff]  ;;  %v1612_v16 = vpack.c.bf16 %v104_v13, %v103_v11  ;;  %p1872_p4 = pnand %p1870_p3, %p1867_p2 }
  0x2a   :  { %v1642_v12 = vpack.c.bf16 %v118_v10, %v117_v9  ;;  %v88_v15 = vld [vmem:[%s2440_s2 + $0x18] sm:$0xff]  ;;  %1611 = vmatpush3.bf16.msra.mxu0 %v1610_v7  ;;  %v135_v18 = vld [vmem:[%s2440_s2 + $0x190] sm:$0xff]  ;;  %v105_v23 = vld [vmem:[%s2440_s2 + $0xa0] sm:$0xff] }
  0x2b   :  { %1641 = vmatprep.subr.bf16.mxu1 %v1640_v8  ;;  %v1614_v17 = vpack.c.bf16 %v88_v15, %v87_v14  ;;  %v136_v19 = vld [vmem:[%s2440_s2 + $0x198] sm:$0xff]  ;;  %v119_v20 = vld [vmem:[%s2440_s2 + $0x110] sm:$0xff]  ;;  %v106_v24 = vld [vmem:[%s2440_s2 + $0xa8] sm:$0xff]  ;;  %1613 = vmatprep.subr.bf16.mxu0 %v1612_v16 }
  0x2c   :  { %1643 = vmatpush3.bf16.msra.mxu1 %v1642_v12  ;;  %v1644_v21 = vpack.c.bf16 %v136_v19, %v135_v18  ;;  %v120_v22 = vld [vmem:[%s2440_s2 + $0x118] sm:$0xff]  ;;  %v1616_v26 = vpack.c.bf16 %v106_v24, %v105_v23  ;;  %v89_v27 = vld [vmem:[%s2440_s2 + $0x20] sm:$0xff]  ;;  %v90_v28 = vld [vmem:[%s2440_s2 + $0x28] sm:$0xff] }
  0x2d   :  { %v1646_v25 = vpack.c.bf16 %v120_v22, %v119_v20  ;;  %v137_v29 = vld [vmem:[%s2440_s2 + $0x1a0] sm:$0xff]  ;;  %v138_v30 = vld [vmem:[%s2440_s2 + $0x1a8] sm:$0xff]  ;;  %v1618_v33 = vpack.c.bf16 %v90_v28, %v89_v27  ;;  %v107_v35 = vld [vmem:[%s2440_s2 + $0xb0] sm:$0xff] }
  0x2e   :  { %1645 = vmatprep.subr.bf16.mxu1 %v1644_v21  ;;  %v121_v31 = vld [vmem:[%s2440_s2 + $0x120] sm:$0xff]  ;;  %v122_v32 = vld [vmem:[%s2440_s2 + $0x128] sm:$0xff]  ;;  %1615 = vmatpush3.bf16.msra.mxu0 %v1614_v17  ;;  %v1648_v34 = vpack.c.bf16 %v138_v30, %v137_v29  ;;  %v108_v36 = vld [vmem:[%s2440_s2 + $0xb8] sm:$0xff] }
  0x2f   :  { %v91_v37 = vld [vmem:[%s2440_s2 + $0x30] sm:$0xff]  ;;  %1617 = vmatprep.subr.bf16.mxu0 %v1616_v26  ;;  %v1650_v38 = vpack.c.bf16 %v122_v32, %v121_v31  ;;  %v1620_v39 = vpack.c.bf16 %v108_v36, %v107_v35  ;;  %v92_v40 = vld [vmem:[%s2440_s2 + $0x38] sm:$0xff]  ;;  %v109_v46 = vld [vmem:[%s2440_s2 + $0xc0] sm:$0xff] }
  0x30   :  { %1647 = vmatpush3.bf16.msra.mxu1 %v1646_v25  ;;  %v139_v41 = vld [vmem:[%s2440_s2 + $0x1b0] sm:$0xff]  ;;  %v140_v42 = vld [vmem:[%s2440_s2 + $0x1b8] sm:$0xff]  ;;  %v110_v47 = vld [vmem:[%s2440_s2 + $0xc8] sm:$0xff]  ;;  %v1622_v48 = vpack.c.bf16 %v92_v40, %v91_v37 }
  0x31   :  { %1649 = vmatprep.subr.bf16.mxu1 %v1648_v34  ;;  %v1652_v43 = vpack.c.bf16 %v140_v42, %v139_v41  ;;  %v123_v44 = vld [vmem:[%s2440_s2 + $0x130] sm:$0xff]  ;;  %v124_v45 = vld [vmem:[%s2440_s2 + $0x138] sm:$0xff]  ;;  %v141_v49 = vld [vmem:[%s2440_s2 + $0x1c0] sm:$0xff]  ;;  %v1624_v52 = vpack.c.bf16 %v110_v47, %v109_v46 }
  0x32   :  { %1619 = vmatpush3.bf16.msra.mxu0 %v1618_v33  ;;  %v142_v50 = vld [vmem:[%s2440_s2 + $0x1c8] sm:$0xff]  ;;  %v1654_v51 = vpack.c.bf16 %v124_v45, %v123_v44  ;;  %v93_v53 = vld [vmem:[%s2440_s2 + $0x40] sm:$0xff]  ;;  %v111_v58 = vld [vmem:[%s2440_s2 + $0xd0] sm:$0xff] }
  0x33   :  { %1621 = vmatprep.subr.bf16.mxu0 %v1620_v39  ;;  %v94_v54 = vld [vmem:[%s2440_s2 + $0x48] sm:$0xff]  ;;  %v125_v55 = vld [vmem:[%s2440_s2 + $0x140] sm:$0xff]  ;;  %v1656_v56 = vpack.c.bf16 %v142_v50, %v141_v49  ;;  %v112_v59 = vld [vmem:[%s2440_s2 + $0xd8] sm:$0xff] }
  0x34   :  { %1651 = vmatpush3.bf16.msra.mxu1 %v1650_v38  ;;  %v126_v57 = vld [vmem:[%s2440_s2 + $0x148] sm:$0xff]  ;;  %v143_v60 = vld [vmem:[%s2440_s2 + $0x1d0] sm:$0xff]  ;;  %v144_v61 = vld [vmem:[%s2440_s2 + $0x1d8] sm:$0xff]  ;;  %v1626_v62 = vpack.c.bf16 %v94_v54, %v93_v53  ;;  %v1628_v0 = vpack.c.bf16 %v112_v59, %v111_v58 }
  0x35   :  { %1653 = vmatprep.subr.bf16.mxu1 %v1652_v43  ;;  %v1658_v63 = vpack.c.bf16 %v126_v57, %v125_v55  ;;  %v95_v1 = vld [vmem:[%s2440_s2 + $0x50] sm:$0xff]  ;;  %v96_v2 = vld [vmem:[%s2440_s2 + $0x58] sm:$0xff]  ;;  %v1660_v4 = vpack.c.bf16 %v144_v61, %v143_v60  ;;  %v113_v6 = vld [vmem:[%s2440_s2 + $0xe0] sm:$0xff] }
  0x36   :  { %1623 = vmatpush3.bf16.msra.mxu0 %v1622_v48  ;;  %v127_v3 = vld [vmem:[%s2440_s2 + $0x150] sm:$0xff]  ;;  %v128_v5 = vld [vmem:[%s2440_s2 + $0x158] sm:$0xff]  ;;  %v114_v7 = vld [vmem:[%s2440_s2 + $0xe8] sm:$0xff]  ;;  %v1630_v10 = vpack.c.bf16 %v96_v2, %v95_v1 }
  0x37   :  { %1625 = vmatprep.subr.bf16.mxu0 %v1624_v52  ;;  %v145_v8 = vld [vmem:[%s2440_s2 + $0x1e0] sm:$0xff]  ;;  %v146_v9 = vld [vmem:[%s2440_s2 + $0x1e8] sm:$0xff]  ;;  %v1662_v13 = vpack.c.bf16 %v128_v5, %v127_v3  ;;  %v1632_v14 = vpack.c.bf16 %v114_v7, %v113_v6  ;;  %v115_v19 = vld [vmem:[%s2440_s2 + $0xf0] sm:$0xff] }
  0x38   :  { %1655 = vmatpush3.bf16.msra.mxu1 %v1654_v51  ;;  %v97_v11 = vld [vmem:[%s2440_s2 + $0x60] sm:$0xff]  ;;  %v74_v12 = vld [vmem:[%s2438_s0 + $0x8] sm:$0xff]  ;;  %v1664_v18 = vpack.c.bf16 %v146_v9, %v145_v8  ;;  %v116_v20 = vld [vmem:[%s2440_s2 + $0xf8] sm:$0xff] }
  0x39   :  { %1657 = vmatprep.subr.bf16.mxu1 %v1656_v56  ;;  %v98_v15 = vld [vmem:[%s2440_s2 + $0x68] sm:$0xff]  ;;  %v129_v16 = vld [vmem:[%s2440_s2 + $0x160] sm:$0xff]  ;;  %252 = vmatprep.mubr.f32.mxu0 %v74_v12  ;;  %v76_v21 = vld [vmem:[%s2438_s0 + $0x18] sm:$0xff]  ;;  %v1636_v26 = vpack.c.bf16 %v116_v20, %v115_v19 }
  0x3a   :  { %1627 = vmatpush3.bf16.msra.mxu0 %v1626_v62  ;;  %v130_v17 = vld [vmem:[%s2440_s2 + $0x168] sm:$0xff]  ;;  %v147_v22 = vld [vmem:[%s2440_s2 + $0x1f0] sm:$0xff]  ;;  %v148_v23 = vld [vmem:[%s2440_s2 + $0x1f8] sm:$0xff]  ;;  %327 = vmatprep.mubr.f32.mxu1 %v76_v21  ;;  %v1634_v24 = vpack.c.bf16 %v98_v15, %v97_v11 }
  0x3b   :  { %1629 = vmatprep.subr.bf16.mxu0 %v1628_v0  ;;  %v1666_v25 = vpack.c.bf16 %v130_v17, %v129_v16  ;;  %v99_v27 = vld [vmem:[%s2440_s2 + $0x70] sm:$0xff]  ;;  %v100_v28 = vld [vmem:[%s2440_s2 + $0x78] sm:$0xff]  ;;  %v1668_v30 = vpack.c.bf16 %v148_v23, %v147_v22  ;;  %v165_v32 = vld [vmem:[%s2440_s2 + $0x280] sm:$0xff] }
  0x3c   :  { %1659 = vmatpush3.bf16.msra.mxu1 %v1658_v63  ;;  %v131_v29 = vld [vmem:[%s2440_s2 + $0x170] sm:$0xff]  ;;  %v132_v31 = vld [vmem:[%s2440_s2 + $0x178] sm:$0xff]  ;;  %v166_v33 = vld [vmem:[%s2440_s2 + $0x288] sm:$0xff]  ;;  %v1638_v34 = vpack.c.bf16 %v100_v28, %v99_v27 }
  0x3d   :  { %1661 = vmatprep.subr.bf16.mxu1 %v1660_v4  ;;  %v1670_v35 = vpack.c.bf16 %v132_v31, %v131_v29  ;;  %v1672_v36 = vpack.c.bf16 %v166_v33, %v165_v32  ;;  %v149_v37 = vld [vmem:[%s2440_s2 + $0x200] sm:$0xff]  ;;  %v150_v38 = vld [vmem:[%s2440_s2 + $0x208] sm:$0xff]  ;;  %v167_v39 = vld [vmem:[%s2440_s2 + $0x290] sm:$0xff] }
  0x3e   :  { %1631 = vmatpush3.bf16.msra.mxu0 %v1630_v10  ;;  %v168_v40 = vld [vmem:[%s2440_s2 + $0x298] sm:$0xff]  ;;  %v73_v41 = vld [vmem:[%s2438_s0] sm:$0xff]  ;;  %v1674_v42 = vpack.c.bf16 %v150_v38, %v149_v37  ;;  %v75_v43 = vld [vmem:[%s2438_s0 + $0x10] sm:$0xff] }
  0x3f   :  { %1633 = vmatprep.subr.bf16.mxu0 %v1632_v14  ;;  %v1676_v44 = vpack.c.bf16 %v168_v40, %v167_v39  ;;  %v151_v45 = vld [vmem:[%s2440_s2 + $0x210] sm:$0xff]  ;;  %v152_v46 = vld [vmem:[%s2440_s2 + $0x218] sm:$0xff]  ;;  %v169_v47 = vld [vmem:[%s2440_s2 + $0x2a0] sm:$0xff] }
  0x40   :  { %1663 = vmatpush3.bf16.msra.mxu1 %v1662_v13  ;;  %v170_v48 = vld [vmem:[%s2440_s2 + $0x2a8] sm:$0xff]  ;;  %v82_v50 = vld [vmem:[%s2439_s1 + $0x18] sm:$0xff]  ;;  %v1678_v51 = vpack.c.bf16 %v152_v46, %v151_v45  ;;  %v79_v52 = vld [vmem:[%s2439_s1] sm:$0xff] }
  0x41   :  { %1665 = vmatprep.subr.bf16.mxu1 %v1664_v18  ;;  %v80_v49 = vld [vmem:[%s2439_s1 + $0x8] sm:$0xff]  ;;  %v1680_v53 = vpack.c.bf16 %v170_v48, %v169_v47  ;;  %v153_v54 = vld [vmem:[%s2440_s2 + $0x220] sm:$0xff]  ;;  %v81_v56 = vld [vmem:[%s2439_s1 + $0x10] sm:$0xff] }
  0x42   :  { %1635 = vmatpush3.bf16.msra.mxu0 %v1634_v24  ;;  %v154_v55 = vld [vmem:[%s2440_s2 + $0x228] sm:$0xff]  ;;  %v171_v57 = vld [vmem:[%s2440_s2 + $0x2b0] sm:$0xff]  ;;  %v172_v58 = vld [vmem:[%s2440_s2 + $0x2b8] sm:$0xff] }
  0x43   :  { %1637 = vmatprep.subr.bf16.mxu0 %v1636_v26  ;;  %v78_v59 = vld [vmem:[%s2438_s0 + $0x28] sm:$0xff]  ;;  %v1682_v60 = vpack.c.bf16 %v154_v55, %v153_v54  ;;  %v1684_v61 = vpack.c.bf16 %v172_v58, %v171_v57  ;;  %v155_v62 = vld [vmem:[%s2440_s2 + $0x230] sm:$0xff]  ;;  %v156_v63 = vld [vmem:[%s2440_s2 + $0x238] sm:$0xff] }
  0x44   :  { %1667 = vmatpush3.bf16.msra.mxu1 %v1666_v25  ;;  %v173_v0 = vld [vmem:[%s2440_s2 + $0x2c0] sm:$0xff]  ;;  %v174_v1 = vld [vmem:[%s2440_s2 + $0x2c8] sm:$0xff]  ;;  %v1686_v2 = vpack.c.bf16 %v156_v63, %v155_v62  ;;  %v175_v6 = vld [vmem:[%s2440_s2 + $0x2d0] sm:$0xff] }
  0x45   :  { %1669 = vmatprep.subr.bf16.mxu1 %v1668_v30  ;;  %v1688_v3 = vpack.c.bf16 %v174_v1, %v173_v0  ;;  %v157_v4 = vld [vmem:[%s2440_s2 + $0x240] sm:$0xff]  ;;  %v158_v5 = vld [vmem:[%s2440_s2 + $0x248] sm:$0xff]  ;;  %v176_v7 = vld [vmem:[%s2440_s2 + $0x2d8] sm:$0xff] }
  0x46   :  { %1639 = vmatpush3.bf16.msra.mxu0 %v1638_v34  ;;  %v1690_v8 = vpack.c.bf16 %v158_v5, %v157_v4  ;;  %v1692_v9 = vpack.c.bf16 %v176_v7, %v175_v6  ;;  %v159_v10 = vld [vmem:[%s2440_s2 + $0x250] sm:$0xff]  ;;  %v160_v11 = vld [vmem:[%s2440_s2 + $0x258] sm:$0xff]  ;;  %v177_v12 = vld [vmem:[%s2440_s2 + $0x2e0] sm:$0xff] }
  0x47   :  { %1673 = vmatprep.subr.bf16.mxu0 %v1672_v36  ;;  %v178_v13 = vld [vmem:[%s2440_s2 + $0x2e8] sm:$0xff]  ;;  %v1694_v14 = vpack.c.bf16 %v160_v11, %v159_v10  ;;  %v161_v16 = vld [vmem:[%s2440_s2 + $0x260] sm:$0xff]  ;;  %v179_v18 = vld [vmem:[%s2440_s2 + $0x2f0] sm:$0xff] }
  0x48   :  { %1671 = vmatpush3.bf16.msra.mxu1 %v1670_v35  ;;  %v1696_v15 = vpack.c.bf16 %v178_v13, %v177_v12  ;;  %v162_v17 = vld [vmem:[%s2440_s2 + $0x268] sm:$0xff]  ;;  %v180_v19 = vld [vmem:[%s2440_s2 + $0x2f8] sm:$0xff]  ;;  %v163_v22 = vld [vmem:[%s2440_s2 + $0x270] sm:$0xff] }
  0x49   :  { %253 = vmatmul.mubr.f32.vlgmr.msra.gmra.mrb[0].mxu0 %v73_v41  ;;  %v1698_v20 = vpack.c.bf16 %v162_v17, %v161_v16  ;;  %v1700_v21 = vpack.c.bf16 %v180_v19, %v179_v18  ;;  %v164_v23 = vld [vmem:[%s2440_s2 + $0x278] sm:$0xff]  ;;  %v77_v25 = vld [vmem:[%s2438_s0 + $0x20] sm:$0xff]  ;;  %v84_v26 = vld [vmem:[%s2439_s1 + $0x28] sm:$0xff] }
  0x4a   :  { %1675 = vmatpush3.bf16.msra.mxu0 %v1674_v42  ;;  %257 = vmatprep.mubr.f32.mxu0 %v80_v49  ;;  %v1702_v24 = vpack.c.bf16 %v164_v23, %v163_v22  ;;  %v83_v27 = vld [vmem:[%s2439_s1 + $0x20] sm:$0xff]  ;;  %v414_v29 = vld [vmem:[%s2442_s4 + $0x8] sm:$0xff]  ;;  %v415_v30 = vld [vmem:[%s2442_s4 + $0x10] sm:$0xff] }
  0x4b   :  { %328 = vmatmul.mubr.f32.vlgmr.msra.gmra.mrb[0].mxu1 %v75_v43  ;;  %1677 = vmatprep.subr.bf16.mxu0 %v1676_v44  ;;  %v413_v28 = vld [vmem:[%s2442_s4] sm:$0xff]  ;;  %v416_v32 = vld [vmem:[%s2442_s4 + $0x18] sm:$0xff]  ;;  %v418_v35 = vld [vmem:[%s2442_s4 + $0x28] sm:$0xff] }
  0x4c   :  { %332 = vmatprep.mubr.f32.mxu1 %v82_v50  ;;  %v1704_v31 = vpack.c.bf16 %v414_v29, %v413_v28  ;;  %v1708_v33 = vpack.c.bf16 %v416_v32, %v415_v30  ;;  %v417_v34 = vld [vmem:[%s2442_s4 + $0x20] sm:$0xff]  ;;  %v419_v37 = vld [vmem:[%s2442_s4 + $0x30] sm:$0xff]  ;;  %v420_v38 = vld [vmem:[%s2442_s4 + $0x38] sm:$0xff] }
  0x4d   :  { %258 = vmatmul.mubr.f32.gmra.mrb[2].mxu0 %v79_v52  ;;  %v1712_v36 = vpack.c.bf16 %v418_v35, %v417_v34  ;;  %v1716_v39 = vpack.c.bf16 %v420_v38, %v419_v37  ;;  %v421_v40 = vld [vmem:[%s2442_s4 + $0x40] sm:$0xff]  ;;  %v422_v41 = vld [vmem:[%s2442_s4 + $0x48] sm:$0xff]  ;;  %v423_v43 = vld [vmem:[%s2442_s4 + $0x50] sm:$0xff] }
  0x4e   :  { %1679 = vmatpush3.bf16.msra.mxu0 %v1678_v51  ;;  %402 = vmatprep.mubr.f32.mxu0 %v78_v59  ;;  %v1720_v42 = vpack.c.bf16 %v422_v41, %v421_v40  ;;  %v424_v44 = vld [vmem:[%s2442_s4 + $0x58] sm:$0xff]  ;;  %v425_v46 = vld [vmem:[%s2442_s4 + $0x60] sm:$0xff]  ;;  %v426_v47 = vld [vmem:[%s2442_s4 + $0x68] sm:$0xff] }
  0x4f   :  { %333 = vmatmul.mubr.f32.gmra.mrb[2].mxu1 %v81_v56  ;;  %1681 = vmatprep.subr.bf16.mxu0 %v1680_v53  ;;  %v1724_v45 = vpack.c.bf16 %v424_v44, %v423_v43  ;;  %v1728_v48 = vpack.c.bf16 %v426_v47, %v425_v46  ;;  %v427_v49 = vld [vmem:[%s2442_s4 + $0x70] sm:$0xff]  ;;  %v428_v50 = vld [vmem:[%s2442_s4 + $0x78] sm:$0xff]  ;;  %v1253_v53 = vld [vmem:[%s2441_s3] ss:$0 sm:$0xff] }
  0x50   :  { %1705 = vmatprep.subr.bf16.mxu1 %v1704_v31  ;;  %v1732_v51 = vpack.c.bf16 %v428_v50, %v427_v49  ;;  %v570_v13 = vld [vmem:[#allocation2] sm:$0xff]  ;;  %v572_v16 = vld [vmem:[#allocation2 + $0x10] sm:$0xff]  ;;  %v573_v17 = vld [vmem:[#allocation2 + $0x18] sm:$0xff] }
  0x51   :  { %1707 = vmatpush3.bf16.msra.mxu1 %v1704_v31  ;;  %v1740_v18 = vpack.c.bf16 %v573_v17, %v572_v16  ;;  %v574_v19 = vld [vmem:[#allocation2 + $0x20] sm:$0xff]  ;;  %v576_v22 = vld [vmem:[#allocation2 + $0x30] sm:$0xff]  ;;  %v577_v23 = vld [vmem:[#allocation2 + $0x38] sm:$0xff] }
  0x52   :  { %1683 = vmatpush3.bf16.msra.mxu0 %v1682_v60  ;;  %1709 = vmatprep.subr.bf16.mxu1 %v1708_v33  ;;  %v580_v28 = vld [vmem:[#allocation2 + $0x50] sm:$0xff]  ;;  %v581_v29 = vld [vmem:[#allocation2 + $0x58] sm:$0xff]  ;;  %v582_v31 = vld [vmem:[#allocation2 + $0x60] sm:$0xff] }
  0x53   :  { %1685 = vmatprep.subr.bf16.mxu0 %v1684_v61  ;;  %v1756_v30 = vpack.c.bf16 %v581_v29, %v580_v28  ;;  %v583_v32 = vld [vmem:[#allocation2 + $0x68] sm:$0xff]  ;;  %v584_v34 = vld [vmem:[#allocation2 + $0x70] sm:$0xff]  ;;  %v585_v35 = vld [vmem:[#allocation2 + $0x78] sm:$0xff] }
  0x54   :  { %v1254_v37 = vld [vmem:[%s2443_s5] ss:$0 sm:$0xff]  ;;  %v729_v28 = vld [vmem:[#allocation5 + $0x18] sm:$0xff] }
  0x55   :  { %1711 = vmatpush3.bf16.msra.mxu1 %v1708_v33  ;;  %v1760_v33 = vpack.c.bf16 %v583_v32, %v582_v31  ;;  %v1256_v17 = vld [vmem:[%s2445_s7] ss:$0 sm:$0xff]  ;;  %v731_v31 = vld [vmem:[#allocation5 + $0x28] sm:$0xff] }
  0x56   :  { %1687 = vmatpush3.bf16.msra.mxu0 %v1686_v2  ;;  %1713 = vmatprep.subr.bf16.mxu1 %v1712_v36 }
  0x57   :  { %1689 = vmatprep.subr.bf16.mxu0 %v1688_v3 }
  0x59   :  { %1715 = vmatpush3.bf16.msra.mxu1 %v1712_v36  ;;  %v1764_v36 = vpack.c.bf16 %v585_v35, %v584_v34  ;;  %v733_v34 = vld [vmem:[#allocation5 + $0x38] sm:$0xff] }
  0x5a   :  { %1691 = vmatpush3.bf16.msra.mxu0 %v1690_v8  ;;  %1717 = vmatprep.subr.bf16.mxu1 %v1716_v39 }
  0x5b   :  { %1693 = vmatprep.subr.bf16.mxu0 %v1692_v9 }
  0x5d   :  { %1719 = vmatpush3.bf16.msra.mxu1 %v1716_v39 }
  0x5e   :  { %1695 = vmatpush3.bf16.msra.mxu0 %v1694_v14  ;;  %1721 = vmatprep.subr.bf16.mxu1 %v1720_v42  ;;  %v571_v14 = vld [vmem:[#allocation2 + $0x8] sm:$0xff] }
  0x5f   :  { %1697 = vmatprep.subr.bf16.mxu0 %v1696_v15  ;;  %v1736_v15 = vpack.c.bf16 %v571_v14, %v570_v13  ;;  %v1255_v13 = vld [vmem:[%s2444_s6] ss:$0 sm:$0xff] }
  0x61   :  { %1723 = vmatpush3.bf16.msra.mxu1 %v1720_v42 }
  0x62   :  { %1699 = vmatpush3.bf16.msra.mxu0 %v1698_v20  ;;  %1725 = vmatprep.subr.bf16.mxu1 %v1724_v45  ;;  %v575_v20 = vld [vmem:[#allocation2 + $0x28] sm:$0xff] }
  0x63   :  { %1701 = vmatprep.subr.bf16.mxu0 %v1700_v21  ;;  %v1744_v21 = vpack.c.bf16 %v575_v20, %v574_v19 }
  0x65   :  { %1727 = vmatpush3.bf16.msra.mxu1 %v1724_v45 }
  0x66   :  { %1703 = vmatpush3.bf16.msra.mxu0 %v1702_v24  ;;  %1729 = vmatprep.subr.bf16.mxu1 %v1728_v48  ;;  %v1748_v24 = vpack.c.bf16 %v577_v23, %v576_v22 }
  0x67   :  { %1737 = vmatprep.subr.bf16.mxu0 %v1736_v15 }
  0x69   :  { %403 = vmatmul.mubr.f32.vlgmr.msra.gmra.mrb[4].mxu0 %v77_v25  ;;  %1731 = vmatpush3.bf16.msra.mxu1 %v1728_v48  ;;  %v578_v25 = vld [vmem:[#allocation2 + $0x40] sm:$0xff] }
  0x6a   :  { %407 = vmatprep.mubr.f32.mxu0 %v84_v26  ;;  %1733 = vmatprep.subr.bf16.mxu1 %v1732_v51  ;;  %v579_v26 = vld [vmem:[#allocation2 + $0x48] sm:$0xff] }
  0x6b   :  { %1739 = vmatpush3.bf16.msra.mxu0 %v1736_v15 }
  0x6c   :  { %1741 = vmatprep.subr.bf16.mxu0 %v1740_v18 }
  0x6d   :  { %408 = vmatmul.mubr.f32.gmra.mrb[6].mxu0 %v83_v27  ;;  %1735 = vmatpush3.bf16.msra.mxu1 %v1732_v51  ;;  %v1752_v27 = vpack.c.bf16 %v579_v26, %v578_v25  ;;  %v727_v25 = vld [vmem:[#allocation5 + $0x8] sm:$0xff] }
  0x6f   :  { %1743 = vmatpush3.bf16.msra.mxu0 %v1740_v18 }
  0x70   :  { %1745 = vmatprep.subr.bf16.mxu0 %v1744_v21 }
  0x73   :  { %1747 = vmatpush3.bf16.msra.mxu0 %v1744_v21 }
  0x74   :  { %1749 = vmatprep.subr.bf16.mxu0 %v1748_v24 }
  0x77   :  { %1751 = vmatpush3.bf16.msra.mxu0 %v1748_v24  ;;  %v726_v24 = vld [vmem:[#allocation5] sm:$0xff] }
  0x78   :  { %1753 = vmatprep.subr.bf16.mxu0 %v1752_v27  ;;  %v1768_v26 = vpack.c.bf16 %v727_v25, %v726_v24  ;;  %v1258_v24 = vld [vmem:[%s2448_s10] ss:$0 sm:$0xff] }
  0x7a   :  { %1769 = vmatprep.subr.bf16.mxu1 %v1768_v26 }
  0x7b   :  { %1755 = vmatpush3.bf16.msra.mxu0 %v1752_v27  ;;  %v728_v27 = vld [vmem:[#allocation5 + $0x10] sm:$0xff] }
  0x7c   :  { %1757 = vmatprep.subr.bf16.mxu0 %v1756_v30  ;;  %v1772_v29 = vpack.c.bf16 %v729_v28, %v728_v27  ;;  %v1259_v28 = vld [vmem:[%s2449_s11] ss:$0 sm:$0xff] }
  0x7f   :  { %1759 = vmatpush3.bf16.msra.mxu0 %v1756_v30  ;;  %v730_v30 = vld [vmem:[#allocation5 + $0x20] sm:$0xff] }
  0x80   :  { %1761 = vmatprep.subr.bf16.mxu0 %v1760_v33  ;;  %v1776_v32 = vpack.c.bf16 %v731_v31, %v730_v30 }
  0x83   :  { %1763 = vmatpush3.bf16.msra.mxu0 %v1760_v33  ;;  %v732_v33 = vld [vmem:[#allocation5 + $0x30] sm:$0xff] }
  0x84   :  { %1765 = vmatprep.subr.bf16.mxu0 %v1764_v36  ;;  %v1780_v35 = vpack.c.bf16 %v733_v34, %v732_v33 }
  0x87   :  { %1767 = vmatpush3.bf16.msra.mxu0 %v1764_v36  ;;  %v734_v36 = vld [vmem:[#allocation5 + $0x40] sm:$0xff] }
 0x11c   :  { %v1324_v52 = vpop.f32.mrb[0].mxu0 }
 0x11d   :  { %v1325_v54 = vpop.f32.mrb[1].mxu0 }
 0x11e   :  { %v1362_v55 = vpop.f32.mrb[0].mxu1  ;;  %v1326_v56 = vadd.f32 %v1325_v54, %v1324_v52 }
 0x11f   :  { %v1363_v57 = vpop.f32.mrb[1].mxu1 }
 0x120   :  { %v1364_v58 = vadd.f32 %v1363_v57, %v1362_v55  ;;  %v255_v59 = vadd.f32 %v1326_v56, %v1253_v53  ;;  %v1327_v60 = vpop.f32.mrb[2].mxu0 }
 0x121   :  { %v1328_v61 = vpop.f32.mrb[3].mxu0 }
 0x122   :  { %v1365_v62 = vpop.f32.mrb[2].mxu1  ;;  %v330_v63 = vadd.f32 %v1364_v58, %v255_v59  ;;  %v1329_v0 = vadd.f32 %v1328_v61, %v1327_v60 }
 0x123   :  { %v1366_v1 = vpop.f32.mrb[3].mxu1 }
 0x124   :  { %v1367_v2 = vadd.f32 %v1366_v1, %v1365_v62  ;;  %v260_v3 = vadd.f32 %v1329_v0, %v1253_v53 }
 0x126   :  { %v335_v4 = vadd.f32 %v1367_v2, %v260_v3 }
 0x13c   :  { %v1400_v5 = vpop.f32.mrb[4].mxu0 }
 0x13d   :  { %v1401_v6 = vpop.f32.mrb[5].mxu0 }
 0x13e   :  { %v1402_v7 = vadd.f32 %v1401_v6, %v1400_v5 }
 0x140   :  { %v405_v8 = vadd.f32 %v1402_v7, %v330_v63  ;;  %v1403_v9 = vpop.f32.mrb[6].mxu0 }
 0x141   :  { %v1404_v10 = vpop.f32.mrb[7].mxu0 }
 0x142   :  { %v1405_v11 = vadd.f32 %v1404_v10, %v1403_v9  ;;  %1509 = vmatprep.mubr.f32.mxu1 %v405_v8 }
 0x144   :  { %v410_v12 = vadd.f32 %v1405_v11, %v335_v4 }
 0x146   :  { %1510 = vmatmul.mubr.f32.vlgmr.msra.gmra.mrb[4].mxu1 %v410_v12 }
 0x147   :  { %1771 = vmatpush3.bf16.msra.mxu1 %v1768_v26 }
 0x148   :  { %1773 = vmatprep.subr.bf16.mxu1 %v1772_v29 }
 0x14b   :  { %1775 = vmatpush3.bf16.msra.mxu1 %v1772_v29 }
 0x14c   :  { %1777 = vmatprep.subr.bf16.mxu1 %v1776_v32 }
 0x14f   :  { %1779 = vmatpush3.bf16.msra.mxu1 %v1776_v32 }
 0x150   :  { %1781 = vmatprep.subr.bf16.mxu1 %v1780_v35 }
 0x153   :  { %1783 = vmatpush3.bf16.msra.mxu1 %v1780_v35 }
 0x219   :  { %v1511_v38 = vpop.f32.mrb[4].mxu1 }
 0x21a   :  { %v508_v39 = vadd.f32 %v1511_v38, %v1254_v37  ;;  %v502_v40 = vpop.f32.mrb[5].mxu1 }
 0x21b   :  { %v503_v41 = vadd.f32 %v1254_v37, %v502_v40  ;;  %v735_v37 = vld [vmem:[#allocation5 + $0x48] sm:$0xff]  ;;  %v737_v40 = vld [vmem:[#allocation5 + $0x58] sm:$0xff] }
 0x21c   :  { %v517_v42 = vrot.slane %v508_v39, 4  ;;  %v1784_v38 = vpack.c.bf16 %v735_v37, %v734_v36 }
 0x21d   :  { %v511_v43 = vrot.slane %v503_v41, 4 }
 0x21e   :  { %v518_v44 = vadd.f32 %v517_v42, %v508_v39  ;;  %1785 = vmatprep.subr.bf16.mxu1 %v1784_v38  ;;  %v738_v42 = vld [vmem:[#allocation5 + $0x60] sm:$0xff] }
 0x21f   :  { %v512_v45 = vadd.f32 %v511_v43, %v503_v41  ;;  %1787 = vmatpush3.bf16.msra.mxu1 %v1784_v38  ;;  %v739_v43 = vld [vmem:[#allocation5 + $0x68] sm:$0xff] }
 0x220   :  { %v519_v46 = vrot.slane %v518_v44, 2 }
 0x221   :  { %v513_v47 = vrot.slane %v512_v45, 2 }
 0x222   :  { %v520_v48 = vadd.f32 %v519_v46, %v518_v44  ;;  %v1792_v44 = vpack.c.bf16 %v739_v43, %v738_v42  ;;  %v741_v46 = vld [vmem:[#allocation5 + $0x78] sm:$0xff] }
 0x223   :  { %v514_v49 = vadd.f32 %v513_v47, %v512_v45  ;;  %v740_v45 = vld [vmem:[#allocation5 + $0x70] sm:$0xff] }
 0x224   :  { %v521_v50 = vrot.slane %v520_v48, 1  ;;  %v1796_v47 = vpack.c.bf16 %v741_v46, %v740_v45 }
 0x225   :  { %v515_v51 = vrot.slane %v514_v49, 1 }
 0x226   :  { %v522_v52 = vadd.f32 %v521_v50, %v520_v48  ;;  %v1257_v48 = vld [vmem:[%s2447_s9] ss:$0 sm:$0xff] }
 0x227   :  { %v516_v53 = vadd.f32 %v515_v51, %v514_v49 }
 0x228   :  { %v525_v54 = vmul.f32 0.125, %v522_v52 }
 0x229   :  { %v524_v55 = vmul.f32 0.125, %v516_v53 }
 0x22a   :  { %v527_v56 = vsub.f32 %v508_v39, %v525_v54  ;;  %v736_v39 = vld [vmem:[#allocation5 + $0x50] sm:$0xff] }
 0x22b   :  { %v526_v57 = vsub.f32 %v503_v41, %v524_v55  ;;  %v1788_v41 = vpack.c.bf16 %v737_v40, %v736_v39 }
 0x22c   :  { %v529_v58 = vmul.f32 %v527_v56, %v527_v56 }
 0x22d   :  { %v528_v59 = vmul.f32 %v526_v57, %v526_v57  ;;  %1789 = vmatprep.subr.bf16.mxu1 %v1788_v41 }
 0x22e   :  { %v536_v60 = vrot.slane %v529_v58, 4  ;;  %1791 = vmatpush3.bf16.msra.mxu1 %v1788_v41 }
 0x22f   :  { %v530_v61 = vrot.slane %v528_v59, 4  ;;  %1793 = vmatprep.subr.bf16.mxu1 %v1792_v44 }
 0x230   :  { %v537_v62 = vadd.f32 %v536_v60, %v529_v58 }
 0x231   :  { %v531_v63 = vadd.f32 %v530_v61, %v528_v59 }
 0x232   :  { %v538_v0 = vrot.slane %v537_v62, 2  ;;  %1795 = vmatpush3.bf16.msra.mxu1 %v1792_v44 }
 0x233   :  { %v532_v1 = vrot.slane %v531_v63, 2  ;;  %1797 = vmatprep.subr.bf16.mxu1 %v1796_v47 }
 0x234   :  { %v539_v2 = vadd.f32 %v538_v0, %v537_v62 }
 0x235   :  { %v533_v3 = vadd.f32 %v532_v1, %v531_v63 }
 0x236   :  { %v540_v4 = vrot.slane %v539_v2, 1  ;;  %1799 = vmatpush3.bf16.msra.mxu1 %v1796_v47 }
 0x237   :  { %v534_v5 = vrot.slane %v533_v3, 1 }
 0x238   :  { %v541_v6 = vadd.f32 %v540_v4, %v539_v2 }
 0x239   :  { %v535_v7 = vadd.f32 %v534_v5, %v533_v3 }
 0x23a   :  { %v543_v8 = vmul.f32 0.125, %v541_v6 }
 0x23b   :  { %v542_v9 = vmul.f32 0.125, %v535_v7 }
 0x23c   :  { %v545_v10 = vadd.f32 1e-05, %v543_v8 }
 0x23d   :  { %v544_v11 = vadd.f32 1e-05, %v542_v9 }
 0x23e   :  { %1810 = vrsqrt.f32 %v545_v10 }
 0x23f   :  { %1812 = vrsqrt.f32 %v544_v11 }
 0x248   :  { %v1811_v12 = vpop.eup %1810 }
 0x249   :  { %v1813_v14 = vpop.eup %1812  ;;  %v549_v15 = vmul.f32 %v1811_v12, %v527_v56 }
 0x24a   :  { %v548_v16 = vmul.f32 %v1813_v14, %v526_v57 }
 0x24b   :  { %v558_v18 = vmul.f32 %v1255_v13, %v549_v15 }
 0x24c   :  { %v557_v19 = vmul.f32 %v1255_v13, %v548_v16 }
 0x24d   :  { %v567_v20 = vadd.f32 %v1256_v17, %v558_v18 }
 0x24e   :  { %v566_v21 = vadd.f32 %v1256_v17, %v557_v19 }
 0x24f   :  { %v569_v23 = vmax.f32 %v567_v20, 0.0 }
 0x250   :  { %v568_v22 = vmax.f32 %v566_v21, 0.0 }
 0x252   :  { %1544 = vmatprep.mubr.f32.mxu0 %v568_v22 }
 0x253   :  { %1545 = vmatmul.mubr.f32.vlgmr.msra.gmra.mrb[8].mxu0 %v569_v23 }
 0x326   :  { %v1546_v49 = vpop.f32.mrb[8].mxu0 }
 0x327   :  { %v665_v50 = vadd.f32 %v1546_v49, %v1257_v48  ;;  %v659_v51 = vpop.f32.mrb[9].mxu0 }
 0x328   :  { %v660_v52 = vadd.f32 %v1257_v48, %v659_v51 }
 0x329   :  { %v674_v53 = vrot.slane %v665_v50, 4 }
 0x32a   :  { %v668_v54 = vrot.slane %v660_v52, 4 }
 0x32b   :  { %v675_v55 = vadd.f32 %v674_v53, %v665_v50 }
 0x32c   :  { %v669_v56 = vadd.f32 %v668_v54, %v660_v52 }
 0x32d   :  { %v676_v57 = vrot.slane %v675_v55, 2 }
 0x32e   :  { %v670_v58 = vrot.slane %v669_v56, 2 }
 0x32f   :  { %v677_v59 = vadd.f32 %v676_v57, %v675_v55 }
 0x330   :  { %v671_v60 = vadd.f32 %v670_v58, %v669_v56 }
 0x331   :  { %v678_v61 = vrot.slane %v677_v59, 1 }
 0x332   :  { %v672_v62 = vrot.slane %v671_v60, 1 }
 0x333   :  { %v679_v63 = vadd.f32 %v678_v61, %v677_v59 }
 0x334   :  { %v673_v0 = vadd.f32 %v672_v62, %v671_v60 }
 0x335   :  { %v681_v1 = vmul.f32 0.125, %v679_v63 }
 0x336   :  { %v680_v2 = vmul.f32 0.125, %v673_v0 }
 0x337   :  { %v683_v3 = vsub.f32 %v665_v50, %v681_v1 }
 0x338   :  { %v682_v4 = vsub.f32 %v660_v52, %v680_v2 }
 0x339   :  { %v685_v5 = vmul.f32 %v683_v3, %v683_v3 }
 0x33a   :  { %v684_v6 = vmul.f32 %v682_v4, %v682_v4 }
 0x33b   :  { %v692_v7 = vrot.slane %v685_v5, 4 }
 0x33c   :  { %v686_v8 = vrot.slane %v684_v6, 4 }
 0x33d   :  { %v693_v9 = vadd.f32 %v692_v7, %v685_v5 }
 0x33e   :  { %v687_v10 = vadd.f32 %v686_v8, %v684_v6 }
 0x33f   :  { %v694_v11 = vrot.slane %v693_v9, 2 }
 0x340   :  { %v688_v12 = vrot.slane %v687_v10, 2 }
 0x341   :  { %v695_v13 = vadd.f32 %v694_v11, %v693_v9 }
 0x342   :  { %v689_v14 = vadd.f32 %v688_v12, %v687_v10 }
 0x343   :  { %v696_v15 = vrot.slane %v695_v13, 1 }
 0x344   :  { %v690_v16 = vrot.slane %v689_v14, 1 }
 0x345   :  { %v697_v17 = vadd.f32 %v696_v15, %v695_v13 }
 0x346   :  { %v691_v18 = vadd.f32 %v690_v16, %v689_v14 }
 0x347   :  { %v699_v19 = vmul.f32 0.125, %v697_v17 }
 0x348   :  { %v698_v20 = vmul.f32 0.125, %v691_v18 }
 0x349   :  { %v701_v21 = vadd.f32 1e-05, %v699_v19 }
 0x34a   :  { %v700_v22 = vadd.f32 1e-05, %v698_v20 }
 0x34b   :  { %1814 = vrsqrt.f32 %v701_v21 }
 0x34c   :  { %1816 = vrsqrt.f32 %v700_v22 }
 0x355   :  { %v1815_v23 = vpop.eup %1814 }
 0x356   :  { %v1817_v25 = vpop.eup %1816  ;;  %v705_v26 = vmul.f32 %v1815_v23, %v683_v3 }
 0x357   :  { %v704_v27 = vmul.f32 %v1817_v25, %v682_v4 }
 0x358   :  { %v714_v29 = vmul.f32 %v1258_v24, %v705_v26 }
 0x359   :  { %v713_v30 = vmul.f32 %v1258_v24, %v704_v27  ;;  %v1097_v27 = vlaneseq }
 0x35a   :  { %v723_v31 = vadd.f32 %v1259_v28, %v714_v29 }
 0x35b   :  { %v722_v32 = vadd.f32 %v1259_v28, %v713_v30  ;;  %v2390_v28 = vshrl.u32 %v1097_v27, 7 }
 0x35c   :  { %v725_v34 = vmax.f32 %v723_v31, 0.0  ;;  %v2393_v31 = vand.u32 127, %v1097_v27 }
 0x35d   :  { %v724_v33 = vmax.f32 %v722_v32, 0.0  ;;  %v1099_v30 = vadd.s32 8, %v2390_v28 }
 0x35e   :  { %vm1116_vm2 = vcmp.eq.s32.totalorder %v2390_v28, %v2393_v31 }
 0x35f   :  { %1579 = vmatprep.mubr.f32.mxu1 %v724_v33  ;;  %vm1117_vm1 = vcmp.eq.s32.totalorder %v1099_v30, %v2393_v31 }
 0x360   :  { %1580 = vmatmul.mubr.f32.vlgmr.msra.gmra.mrb[6].mxu1 %v725_v34 }
 0x433   :  { %v1581_v35 = vpop.f32.mrb[6].mxu1 }
 0x434   :  { %v823_v36 = vrot.slane %v1581_v35, 4  ;;  %v808_v37 = vpop.f32.mrb[7].mxu1 }
 0x435   :  { %v817_v38 = vrot.slane %v808_v37, 4 }
 0x436   :  { %v824_v39 = vadd.f32 %v1581_v35, %v823_v36 }
 0x437   :  { %v818_v40 = vadd.f32 %v817_v38, %v808_v37 }
 0x438   :  { %v825_v41 = vrot.slane %v824_v39, 2 }
 0x439   :  { %v819_v42 = vrot.slane %v818_v40, 2 }
 0x43a   :  { %v826_v43 = vadd.f32 %v825_v41, %v824_v39 }
 0x43b   :  { %v820_v44 = vadd.f32 %v819_v42, %v818_v40 }
 0x43c   :  { %v827_v45 = vrot.slane %v826_v43, 1 }
 0x43d   :  { %v821_v46 = vrot.slane %v820_v44, 1 }
 0x43e   :  { %v828_v47 = vadd.f32 %v827_v45, %v826_v43 }
 0x43f   :  { %v822_v48 = vadd.f32 %v821_v46, %v820_v44 }
 0x440   :  { %v830_v49 = vmul.f32 0.125, %v828_v47 }
 0x441   :  { %v829_v50 = vmul.f32 0.125, %v822_v48 }
 0x442   :  { %v832_v51 = vsub.f32 %v1581_v35, %v830_v49  ;;  %v1100_v49 = vadd.s32 16, %v2390_v28 }
 0x443   :  { %v831_v52 = vsub.f32 %v808_v37, %v829_v50 }
 0x444   :  { %v834_v53 = vmul.f32 %v832_v51, %v832_v51  ;;  %vm1118_vm3 = vcmp.eq.s32.totalorder %v1100_v49, %v2393_v31 }
 0x445   :  { %v833_v54 = vmul.f32 %v831_v52, %v831_v52 }
 0x446   :  { %v841_v55 = vrot.slane %v834_v53, 4 }
 0x447   :  { %v835_v56 = vrot.slane %v833_v54, 4 }
 0x448   :  { %v842_v57 = vadd.f32 %v841_v55, %v834_v53 }
 0x449   :  { %v836_v58 = vadd.f32 %v835_v56, %v833_v54 }
 0x44a   :  { %v843_v59 = vrot.slane %v842_v57, 2 }
 0x44b   :  { %v837_v60 = vrot.slane %v836_v58, 2 }
 0x44c   :  { %v844_v61 = vadd.f32 %v843_v59, %v842_v57 }
 0x44d   :  { %v838_v62 = vadd.f32 %v837_v60, %v836_v58 }
 0x44e   :  { %v845_v63 = vrot.slane %v844_v61, 1 }
 0x44f   :  { %v839_v0 = vrot.slane %v838_v62, 1 }
 0x450   :  { %v846_v1 = vadd.f32 %v845_v63, %v844_v61 }
 0x451   :  { %v840_v2 = vadd.f32 %v839_v0, %v838_v62 }
 0x452   :  { %v848_v3 = vmul.f32 0.125, %v846_v1  ;;  %v1102_v1 = vadd.s32 32, %v2390_v28 }
 0x453   :  { %v847_v4 = vmul.f32 0.125, %v840_v2 }
 0x454   :  { %v850_v5 = vadd.f32 1e-05, %v848_v3  ;;  %vm1120_vm5 = vcmp.eq.s32.totalorder %v1102_v1, %v2393_v31 }
 0x455   :  { %v849_v6 = vadd.f32 1e-05, %v847_v4  ;;  %v1103_v4 = vadd.s32 40, %v2390_v28 }
 0x456   :  { %1818 = vrsqrt.f32 %v850_v5 }
 0x457   :  { %1820 = vrsqrt.f32 %v849_v6  ;;  %vm1121_vm6 = vcmp.eq.s32.totalorder %v1103_v4, %v2393_v31 }
 0x460   :  { %v1819_v7 = vpop.eup %1818 }
 0x461   :  { %v1821_v8 = vpop.eup %1820  ;;  %v854_v9 = vmul.f32 %v1819_v7, %v832_v51  ;;  %v1101_v51 = vadd.s32 24, %v2390_v28 }
 0x462   :  { %v853_v10 = vmul.f32 %v1821_v8, %v831_v52 }
 0x463   :  { %1582 = vmatprep.subr.mxu0 %v854_v9  ;;  %1800 = vmatprep.subr.mxu1 %v854_v9  ;;  %vm1119_vm4 = vcmp.eq.s32.totalorder %v1101_v51, %v2393_v31 }
 0x464   :  { %1583 = vmatpush3.msra.mxu0 %v854_v9  ;;  %1801 = vmatpush3.msra.mxu1 %v854_v9 }
 0x465   :  { %855 = vxpose.xlu0.b32.start.end [1/1] (short) %v853_v10, 128 }
 0x4e5   :  { %v871_v11 = vpop.trf.xlu0 }
 0x4e6   :  { %1584 = vmatprep.mubr.msk.f32.mxu0 %vm887_vm0, %v871_v11 }
 0x4e9   :  { %v872_v12 = vpop.trf.xlu0 }
 0x4ea   :  { %1585 = vmatmul.mubr.msk.f32.vlgmr.msra.gmra.mrb[10].mxu0 %vm887_vm0, %v872_v12 }
 0x4ed   :  { %v873_v13 = vpop.trf.xlu0 }
 0x4ee   :  { %1587 = vmatprep.mubr.msk.f32.mxu0 %vm887_vm0, %v873_v13 }
 0x4f1   :  { %v874_v14 = vpop.trf.xlu0 }
 0x4f2   :  { %1588 = vmatmul.mubr.msk.f32.gmra.mrb[12].mxu0 %vm887_vm0, %v874_v14 }
 0x4f5   :  { %v875_v15 = vpop.trf.xlu0 }
 0x4f6   :  { %1590 = vmatprep.mubr.msk.f32.mxu0 %vm887_vm0, %v875_v15 }
 0x4f9   :  { %v876_v16 = vpop.trf.xlu0 }
 0x4fa   :  { %1591 = vmatmul.mubr.msk.f32.gmra.mrb[14].mxu0 %vm887_vm0, %v876_v16 }
 0x4fd   :  { %v877_v17 = vpop.trf.xlu0 }
 0x4fe   :  { %1593 = vmatprep.mubr.msk.f32.mxu0 %vm887_vm0, %v877_v17 }
 0x501   :  { %v878_v18 = vpop.trf.xlu0 }
 0x502   :  { %1594 = vmatmul.mubr.msk.f32.gmra.mrb[16].mxu0 %vm887_vm0, %v878_v18 }
 0x505   :  { %v879_v19 = vpop.trf.xlu0 }
 0x506   :  { %1596 = vmatprep.mubr.msk.f32.mxu1 %vm887_vm0, %v879_v19  ;;  %v1104_v19 = vadd.s32 48, %v2390_v28 }
 0x508   :  { %vm1122_vm7 = vcmp.eq.s32.totalorder %v1104_v19, %v2393_v31 }
 0x509   :  { %v880_v20 = vpop.trf.xlu0 }
 0x50a   :  { %1597 = vmatmul.mubr.msk.f32.vlgmr.msra.gmra.mrb[8].mxu1 %vm887_vm0, %v880_v20 }
 0x50d   :  { %v881_v21 = vpop.trf.xlu0 }
 0x50e   :  { %1599 = vmatprep.mubr.msk.f32.mxu1 %vm887_vm0, %v881_v21 }
 0x511   :  { %v882_v22 = vpop.trf.xlu0 }
 0x512   :  { %1600 = vmatmul.mubr.msk.f32.gmra.mrb[10].mxu1 %vm887_vm0, %v882_v22  ;;  %v1105_v22 = vadd.s32 56, %v2390_v28 }
 0x514   :  { %vm1123_vm8 = vcmp.eq.s32.totalorder %v1105_v22, %v2393_v31 }
 0x515   :  { %v883_v23 = vpop.trf.xlu0 }
 0x516   :  { %1602 = vmatprep.mubr.msk.f32.mxu1 %vm887_vm0, %v883_v23 }
 0x519   :  { %v884_v24 = vpop.trf.xlu0 }
 0x51a   :  { %1603 = vmatmul.mubr.msk.f32.gmra.mrb[12].mxu1 %vm887_vm0, %v884_v24 }
 0x51d   :  { %v885_v25 = vpop.trf.xlu0 }
 0x51e   :  { %1605 = vmatprep.mubr.msk.f32.mxu1 %vm887_vm0, %v885_v25 }
 0x521   :  { %v886_v26 = vpop.trf.xlu0 }
 0x522   :  { %1606 = vmatmul.mubr.msk.f32.gmra.mrb[14].mxu1 %vm887_vm0, %v886_v26 }
 0x5bd   :  { %v1586_v29 = vpop.f32.mrb[10].mxu0 }
 0x5be   :  { %v1082_v32 = vmul.f32 0.125, %v1586_v29  ;;  %v1002_v33 = vpop.f32.mrb[11].mxu0 }
 0x5bf   :  { %v1081_v34 = vmul.f32 0.125, %v1002_v33 }
 0x5c0   :  { %v1277_v35 = vadd.f32 -1.0, %v1082_v32  ;;  %v1165_v36 = vmul.f32 0.005, %v1082_v32 }
 0x5c1   :  { %v1276_v37 = vadd.f32 -1.0, %v1081_v34  ;;  %v1164_v38 = vmul.f32 0.005, %v1081_v34 }
 0x5c2   :  { %v1149_v39 = vmul.f32 %v1277_v35, %v1277_v35  ;;  %v1181_v40 = vmul.f32 %v1165_v36, %v1082_v32 }
 0x5c3   :  { %v1148_v41 = vmul.f32 %v1276_v37, %v1276_v37  ;;  %v1180_v42 = vmul.f32 %v1164_v38, %v1081_v34 }
 0x5c4   :  { %v1197_v43 = vsel %vm1117_vm1, %v1149_v39, %v1181_v40  ;;  %v1106_v39 = vadd.s32 64, %v2390_v28 }
 0x5c5   :  { %v1196_v44 = vsel %vm1116_vm2, %v1148_v41, %v1180_v42  ;;  %v1589_v45 = vpop.f32.mrb[12].mxu0 }
 0x5c6   :  { %v1212_v46 = vadd.f32 %v1197_v43, %v1196_v44  ;;  %v1084_v47 = vmul.f32 0.125, %v1589_v45  ;;  %v1012_v48 = vpop.f32.mrb[13].mxu0  ;;  %v1107_v43 = vadd.s32 72, %v2390_v28  ;;  %vm1124_vm9 = vcmp.eq.s32.totalorder %v1106_v39, %v2393_v31 }
 0x5c7   :  { %v1083_v50 = vmul.f32 0.125, %v1012_v48 }
 0x5c8   :  { %v1279_v52 = vadd.f32 -1.0, %v1084_v47  ;;  %v1167_v53 = vmul.f32 0.005, %v1084_v47  ;;  %vm1125_vm10 = vcmp.eq.s32.totalorder %v1107_v43, %v2393_v31 }
 0x5c9   :  { %v1278_v54 = vadd.f32 -1.0, %v1083_v50  ;;  %v1166_v55 = vmul.f32 0.005, %v1083_v50 }
 0x5ca   :  { %v1151_v56 = vmul.f32 %v1279_v52, %v1279_v52  ;;  %v1183_v57 = vmul.f32 %v1167_v53, %v1084_v47 }
 0x5cb   :  { %v1150_v58 = vmul.f32 %v1278_v54, %v1278_v54  ;;  %v1182_v59 = vmul.f32 %v1166_v55, %v1083_v50 }
 0x5cc   :  { %v1199_v2 = vsel %vm1119_vm4, %v1151_v56, %v1183_v57  ;;  %v1108_v57 = vadd.s32 80, %v2390_v28 }
 0x5cd   :  { %v1198_v60 = vsel %vm1118_vm3, %v1150_v58, %v1182_v59  ;;  %v1592_v61 = vpop.f32.mrb[14].mxu0 }
 0x5ce   :  { %v1213_v62 = vadd.f32 %v1212_v46, %v1198_v60  ;;  %v1086_v63 = vmul.f32 0.125, %v1592_v61  ;;  %v1022_v0 = vpop.f32.mrb[15].mxu0  ;;  %v1109_v60 = vadd.s32 88, %v2390_v28  ;;  %vm1126_vm11 = vcmp.eq.s32.totalorder %v1108_v57, %v2393_v31 }
 0x5cf   :  { %v1085_v3 = vmul.f32 0.125, %v1022_v0 }
 0x5d0   :  { %v1281_v5 = vadd.f32 -1.0, %v1086_v63  ;;  %v1169_v6 = vmul.f32 0.005, %v1086_v63  ;;  %v1214_v7 = vadd.f32 %v1213_v62, %v1199_v2  ;;  %vm1127_vm12 = vcmp.eq.s32.totalorder %v1109_v60, %v2393_v31 }
 0x5d1   :  { %v1280_v8 = vadd.f32 -1.0, %v1085_v3  ;;  %v1168_v9 = vmul.f32 0.005, %v1085_v3 }
 0x5d2   :  { %v1153_v10 = vmul.f32 %v1281_v5, %v1281_v5  ;;  %v1185_v11 = vmul.f32 %v1169_v6, %v1086_v63 }
 0x5d3   :  { %v1152_v12 = vmul.f32 %v1280_v8, %v1280_v8  ;;  %v1184_v13 = vmul.f32 %v1168_v9, %v1085_v3 }
 0x5d4   :  { %v1201_v20 = vsel %vm1121_vm6, %v1153_v10, %v1185_v11  ;;  %v1110_v11 = vadd.s32 96, %v2390_v28 }
 0x5d5   :  { %v1200_v14 = vsel %vm1120_vm5, %v1152_v12, %v1184_v13  ;;  %v1595_v15 = vpop.f32.mrb[16].mxu0 }
 0x5d6   :  { %v1215_v16 = vadd.f32 %v1214_v7, %v1200_v14  ;;  %v1088_v17 = vmul.f32 0.125, %v1595_v15  ;;  %v1032_v18 = vpop.f32.mrb[17].mxu0  ;;  %vm1128_vm13 = vcmp.eq.s32.totalorder %v1110_v11, %v2393_v31 }
 0x5d7   :  { %v1087_v21 = vmul.f32 0.125, %v1032_v18 }
 0x5d8   :  { %v1283_v23 = vadd.f32 -1.0, %v1088_v17  ;;  %v1171_v24 = vmul.f32 0.005, %v1088_v17  ;;  %v1216_v25 = vadd.f32 %v1215_v16, %v1201_v20  ;;  %v1111_v16 = vadd.s32 104, %v2390_v28 }
 0x5d9   :  { %v1282_v26 = vadd.f32 -1.0, %v1087_v21  ;;  %v1170_v27 = vmul.f32 0.005, %v1087_v21 }
 0x5da   :  { %v1155_v29 = vmul.f32 %v1283_v23, %v1283_v23  ;;  %v1187_v30 = vmul.f32 %v1171_v24, %v1088_v17  ;;  %vm1129_vm14 = vcmp.eq.s32.totalorder %v1111_v16, %v2393_v31 }
 0x5db   :  { %v1154_v32 = vmul.f32 %v1282_v26, %v1282_v26  ;;  %v1186_v33 = vmul.f32 %v1170_v27, %v1087_v21 }
 0x5dc   :  { %v1203_v40 = vsel %vm1123_vm8, %v1155_v29, %v1187_v30  ;;  %v1112_v29 = vadd.s32 112, %v2390_v28 }
 0x5dd   :  { %v1202_v34 = vsel %vm1122_vm7, %v1154_v32, %v1186_v33  ;;  %v1598_v35 = vpop.f32.mrb[8].mxu1 }
 0x5de   :  { %v1217_v36 = vadd.f32 %v1216_v25, %v1202_v34  ;;  %v1090_v37 = vmul.f32 0.125, %v1598_v35  ;;  %v1042_v38 = vpop.f32.mrb[9].mxu1  ;;  %vm1130_vm15 = vcmp.eq.s32.totalorder %v1112_v29, %v2393_v31 }
 0x5df   :  { %v1089_v41 = vmul.f32 0.125, %v1042_v38 }
 0x5e0   :  { %v1218_v42 = vadd.f32 %v1217_v36, %v1203_v40  ;;  %v1285_v44 = vadd.f32 -1.0, %v1090_v37  ;;  %v1173_v45 = vmul.f32 0.005, %v1090_v37  ;;  %v1113_v36 = vadd.s32 120, %v2390_v28 }
 0x5e1   :  { %v1284_v46 = vadd.f32 -1.0, %v1089_v41  ;;  %v1172_v47 = vmul.f32 0.005, %v1089_v41 }
 0x5e2   :  { %v1157_v48 = vmul.f32 %v1285_v44, %v1285_v44  ;;  %v1189_v49 = vmul.f32 %v1173_v45, %v1090_v37  ;;  %vm1131_vm0 = vcmp.eq.s32.totalorder %v1113_v36, %v2393_v31 }
 0x5e3   :  { %v1156_v50 = vmul.f32 %v1284_v46, %v1284_v46  ;;  %v1188_v51 = vmul.f32 %v1172_v47, %v1089_v41 }
 0x5e4   :  { %v1205_v58 = vsel %vm1125_vm10, %v1157_v48, %v1189_v49 }
 0x5e5   :  { %v1204_v52 = vsel %vm1124_vm9, %v1156_v50, %v1188_v51  ;;  %v1601_v53 = vpop.f32.mrb[10].mxu1 }
 0x5e6   :  { %v1219_v54 = vadd.f32 %v1218_v42, %v1204_v52  ;;  %v1092_v55 = vmul.f32 0.125, %v1601_v53  ;;  %v1052_v56 = vpop.f32.mrb[11].mxu1 }
 0x5e7   :  { %v1091_v59 = vmul.f32 0.125, %v1052_v56 }
 0x5e8   :  { %v1287_v61 = vadd.f32 -1.0, %v1092_v55  ;;  %v1175_v62 = vmul.f32 0.005, %v1092_v55  ;;  %v1220_v63 = vadd.f32 %v1219_v54, %v1205_v58 }
 0x5e9   :  { %v1286_v0 = vadd.f32 -1.0, %v1091_v59  ;;  %v1174_v1 = vmul.f32 0.005, %v1091_v59 }
 0x5ea   :  { %v1159_v2 = vmul.f32 %v1287_v61, %v1287_v61  ;;  %v1191_v3 = vmul.f32 %v1175_v62, %v1092_v55 }
 0x5eb   :  { %v1158_v4 = vmul.f32 %v1286_v0, %v1286_v0  ;;  %v1190_v5 = vmul.f32 %v1174_v1, %v1091_v59 }
 0x5ec   :  { %v1207_v12 = vsel %vm1127_vm12, %v1159_v2, %v1191_v3 }
 0x5ed   :  { %v1206_v6 = vsel %vm1126_vm11, %v1158_v4, %v1190_v5  ;;  %v1604_v7 = vpop.f32.mrb[12].mxu1 }
 0x5ee   :  { %v1221_v8 = vadd.f32 %v1220_v63, %v1206_v6  ;;  %v1094_v9 = vmul.f32 0.125, %v1604_v7  ;;  %v1062_v10 = vpop.f32.mrb[13].mxu1 }
 0x5ef   :  { %v1093_v13 = vmul.f32 0.125, %v1062_v10 }
 0x5f0   :  { %v1289_v14 = vadd.f32 -1.0, %v1094_v9  ;;  %v1177_v15 = vmul.f32 0.005, %v1094_v9  ;;  %v1222_v17 = vadd.f32 %v1221_v8, %v1207_v12 }
 0x5f1   :  { %v1288_v18 = vadd.f32 -1.0, %v1093_v13  ;;  %v1176_v19 = vmul.f32 0.005, %v1093_v13 }
 0x5f2   :  { %v1161_v20 = vmul.f32 %v1289_v14, %v1289_v14  ;;  %v1193_v21 = vmul.f32 %v1177_v15, %v1094_v9 }
 0x5f3   :  { %v1160_v22 = vmul.f32 %v1288_v18, %v1288_v18  ;;  %v1192_v23 = vmul.f32 %v1176_v19, %v1093_v13 }
 0x5f4   :  { %v1209_v33 = vsel %vm1129_vm14, %v1161_v20, %v1193_v21 }
 0x5f5   :  { %v1607_v24 = vpop.f32.mrb[14].mxu1  ;;  %v1208_v25 = vsel %vm1128_vm13, %v1160_v22, %v1192_v23 }
 0x5f6   :  { %v1096_v26 = vmul.f32 0.125, %v1607_v24  ;;  %v1072_v27 = vpop.f32.mrb[15].mxu1  ;;  %v1223_v30 = vadd.f32 %v1222_v17, %v1208_v25 }
 0x5f7   :  { %v1095_v32 = vmul.f32 0.125, %v1072_v27 }
 0x5f8   :  { %v1291_v34 = vadd.f32 -1.0, %v1096_v26  ;;  %v1179_v35 = vmul.f32 0.005, %v1096_v26  ;;  %v1224_v37 = vadd.f32 %v1223_v30, %v1209_v33 }
 0x5f9   :  { %v1290_v38 = vadd.f32 -1.0, %v1095_v32  ;;  %v1178_v39 = vmul.f32 0.005, %v1095_v32 }
 0x5fa   :  { %v1163_v40 = vmul.f32 %v1291_v34, %v1291_v34  ;;  %v1195_v41 = vmul.f32 %v1179_v35, %v1096_v26 }
 0x5fb   :  { %v1162_v42 = vmul.f32 %v1290_v38, %v1290_v38  ;;  %v1194_v43 = vmul.f32 %v1178_v39, %v1095_v32 }
 0x5fc   :  { %v1211_v46 = vsel %vm1131_vm0, %v1163_v40, %v1195_v41 }
 0x5fd   :  { %v1210_v44 = vsel %vm1130_vm15, %v1162_v42, %v1194_v43 }
 0x5fe   :  { %v1225_v45 = vadd.f32 %v1224_v37, %v1210_v44 }
 0x600   :  { %v1226_v47 = vadd.f32 %v1225_v45, %v1211_v46 }
 0x602   :  { %1227 = vadd.xlane.f32.xlu0 %v1226_v47 }
 0x68f   :  { %v1228_v48 = vpop.xlane.xlu0 %1227 }
 0x690   :  { %v1229_v49 = vrot.slane %v1228_v48, 4 }
 0x692   :  { %v1230_v50 = vadd.f32 %v1229_v49, %v1228_v48 }
 0x694   :  { %v1231_v28 = vrot.slane %v1230_v50, 2 }
 0x696   :  { %v1232_v51 = vadd.f32 %v1231_v28, %v1230_v50 }
 0x698   :  { %v1233_v52 = vrot.slane %v1232_v51, 1 }
 0x69a   :  { %v1234_v53 = vadd.f32 %v1233_v52, %v1232_v51 }
 0x69c   :  { %1802 = vpush %v1234_v53 }
 0x6cd   :  { %s1803_s10 = spop %1802 }
 0x6ce   :  { %1237 = sst [smem:[#allocation7]] %s1803_s10 }
 0x6cf   :  { %1875 = shalt.err (!%p1872_p4)
}
 0x6d0   :  { %s1886_s12 = smov [#allocation7]  }
 0x6d1   :  { %1245 = dma.smem_to_hbm %s1886_s12, 16, %s2451_s13, [#allocation4]  }
 0x6d2   :  { %1880 = dma.done.wait [#allocation4], 16  }
 0x6d3   :  { %1881 = vsyncadd [#allocation4], 4294967280 }
 0x6d4   :  { %1249 = sfence }
 0x6d5   :  { %1250 = vsyncpa [#allocation3], 1 }
 0x6d6   :  { %1251 = vsyncpa [#allocation6], 1 }
 0x6d7   :  { %1252 = vsyncpa [#allocation4], 1 }

</bundles_post_ra>
